<compile_context>
chip_gen: v6e
topology: v6e:2x2x1
jax: 0.10.0
libtpu: 0.0.40
codegen_flags: <defaults>
</compile_context>

<pallas_src>
import functools
import math

import jax
import jax.numpy as jnp
from jax.experimental import pallas as pl
from jax.experimental.pallas import tpu as pltpu

VMEM = pl.BlockSpec(memory_space=pltpu.MemorySpace.VMEM)
NEG_INF = -1e9


# --------------------------------------------------------------------------- #
# In-kernel helpers
# --------------------------------------------------------------------------- #
def _layernorm(x, g, b, eps=1e-5):
    mu = jnp.mean(x, axis=-1, keepdims=True)
    var = jnp.mean(jnp.square(x - mu), axis=-1, keepdims=True)
    return (x - mu) * jax.lax.rsqrt(var + eps) * g + b


# --------------------------------------------------------------------------- #
# Fused attention block kernel:  y = x + MHA(LN1(x)) @ Wo + bo
# --------------------------------------------------------------------------- #
def _attn_block_kernel(x_ref, pad_ref, g_ref, b_ref, wqkv_ref, bqkv_ref,
                       wo_ref, bo_ref, o_ref, *, batch, ctx, n_heads, d_head,
                       scale):
    B, T, H, Dh = batch, ctx, n_heads, d_head
    Da = H * Dh

    x = x_ref[...]                                        # [B*T, D] f32 (residual)
    h = _layernorm(x, g_ref[...], b_ref[...])             # f32

    # Fused Q/K/V projection: one MXU pass, lane-dense [B*T, 3*Da] output.
    qkv = jnp.dot(h.astype(jnp.bfloat16), wqkv_ref[...],
                  preferred_element_type=jnp.float32) + bqkv_ref[...]

    # Causal + pad additive bias built in-kernel (never touches HBM).
    row = jax.lax.broadcasted_iota(jnp.int32, (T, T), 0)
    col = jax.lax.broadcasted_iota(jnp.int32, (T, T), 1)
    causal = row >= col                                   # [T, T]
    pad = pad_ref[...] > 0.5                              # [B, T] bool
    allowed = causal[None, :, :] & pad[:, None, :]        # [B, T, T]
    bias = jnp.where(allowed, 0.0, NEG_INF).astype(jnp.float32)

    acc = jnp.zeros_like(x)                               # [B*T, D] f32
    for hd in range(H):
        q = qkv[:, hd * Dh:(hd + 1) * Dh].reshape(B, T, Dh)
        k = qkv[:, Da + hd * Dh:Da + (hd + 1) * Dh].reshape(B, T, Dh)
        v = qkv[:, 2 * Da + hd * Dh:2 * Da + (hd + 1) * Dh].reshape(B, T, Dh)

        s = jnp.einsum("bqd,bkd->bqk",
                       q.astype(jnp.bfloat16), k.astype(jnp.bfloat16),
                       preferred_element_type=jnp.float32) * scale + bias
        m = jnp.max(s, axis=-1, keepdims=True)
        p = jnp.exp(s - m)
        p = p * pl.reciprocal(jnp.sum(p, axis=-1, keepdims=True), approx=True)

        oh = jnp.einsum("bqk,bkd->bqd",
                        p.astype(jnp.bfloat16), v.astype(jnp.bfloat16),
                        preferred_element_type=jnp.float32)      # [B, T, Dh]

        # attn @ Wo == sum_h  oh @ Wo[h*Dh:(h+1)*Dh, :]  (avoids concat/transpose)
        acc = acc + jnp.dot(oh.reshape(B * T, Dh).astype(jnp.bfloat16),
                            wo_ref[hd * Dh:(hd + 1) * Dh, :],
                            preferred_element_type=jnp.float32)

    o_ref[...] = x + acc + bo_ref[...]


def attention_block(x2d, pad_f32, lp, batch, ctx, n_heads, d_head):
    M, D = x2d.shape
    kern = functools.partial(_attn_block_kernel, batch=batch, ctx=ctx,
                             n_heads=n_heads, d_head=d_head,
                             scale=1.0 / math.sqrt(d_head))
    return pl.pallas_call(
        kern,
        out_shape=jax.ShapeDtypeStruct((M, D), jnp.float32),
        in_specs=[VMEM] * 8,
        out_specs=VMEM,
    )(x2d, pad_f32, lp["ln1_g"], lp["ln1_b"], lp["wqkv"], lp["bqkv"],
      lp["wo"], lp["bo"])


# --------------------------------------------------------------------------- #
# Fused MLP block kernel:  y = x + GELU(LN2(x) @ W1 + b1) @ W2 + b2
# --------------------------------------------------------------------------- #
def _mlp_block_kernel(x_ref, g_ref, b_ref, w1_ref, b1_ref, w2_ref, b2_ref,
                      o_ref):
    x = x_ref[...]                                        # [M, D] f32
    h = _layernorm(x, g_ref[...], b_ref[...])
    m = jnp.dot(h.astype(jnp.bfloat16), w1_ref[...],
                preferred_element_type=jnp.float32) + b1_ref[...]
    m = jax.nn.gelu(m, approximate=True)                  # f32 elementwise
    y = jnp.dot(m.astype(jnp.bfloat16), w2_ref[...],
                preferred_element_type=jnp.float32) + b2_ref[...]
    o_ref[...] = x + y


def mlp_block(x2d, lp):
    M, D = x2d.shape
    return pl.pallas_call(
        _mlp_block_kernel,
        out_shape=jax.ShapeDtypeStruct((M, D), jnp.float32),
        in_specs=[VMEM] * 7,
        out_specs=VMEM,
    )(x2d, lp["ln2_g"], lp["ln2_b"], lp["w1"], lp["b1"], lp["w2"], lp["b2"])


# --------------------------------------------------------------------------- #
# Tiled final vocab projection (grid matmul with f32 accumulator)
# --------------------------------------------------------------------------- #
def _vocab_proj_kernel(x_ref, w_ref, b_ref, o_ref, acc_ref):
    @pl.when(pl.program_id(2) == 0)
    def _():
        acc_ref[...] = jnp.zeros_like(acc_ref)

    acc_ref[...] += jnp.dot(x_ref[...].astype(jnp.bfloat16), w_ref[...],
                            preferred_element_type=jnp.float32)

    @pl.when(pl.program_id(2) == pl.num_programs(2) - 1)
    def _():
        o_ref[...] = (acc_ref[...] + b_ref[...]).astype(o_ref.dtype)


def _tile(dim, cap):
    # Use the full dim at toy sizes; cap (multiple of 128) when it divides evenly.
    if dim <= cap:
        return dim
    return cap if dim % cap == 0 else dim


def vocab_projection(x2d, w_bf16, b):
    M, D = x2d.shape
    V = w_bf16.shape[1]
    tm, tn, tk = _tile(M, 256), _tile(V, 512), _tile(D, 512)
    grid = (M // tm, V // tn, D // tk)
    return pl.pallas_call(
        _vocab_proj_kernel,
        out_shape=jax.ShapeDtypeStruct((M, V), jnp.float32),
        grid_spec=pltpu.PrefetchScalarGridSpec(
            num_scalar_prefetch=0,
            grid=grid,
            in_specs=[pl.BlockSpec((tm, tk), lambda i, j, k: (i, k)),
                      pl.BlockSpec((tk, tn), lambda i, j, k: (k, j)),
                      pl.BlockSpec((1, tn), lambda i, j, k: (0, j))],
            out_specs=pl.BlockSpec((tm, tn), lambda i, j, k: (i, j)),
            scratch_shapes=[pltpu.VMEM((tm, tn), jnp.float32)]),
        compiler_params=pltpu.CompilerParams(
            dimension_semantics=("parallel", "parallel", "arbitrary")),
    )(x2d, w_bf16, b)


# --------------------------------------------------------------------------- #
# Model (glue code)
# --------------------------------------------------------------------------- #
def init_params(key, vocab_size, n_layers, n_heads, d_model, d_head):
    d_ff = 4 * d_model
    d_attn = n_heads * d_head
    std = 0.02
    layers = []
    for _ in range(n_layers):
        keys = jax.random.split(key, 7)
        key = keys[0]
        wq = std * jax.random.normal(keys[1], (d_model, d_attn), jnp.float32)
        wk = std * jax.random.normal(keys[2], (d_model, d_attn), jnp.float32)
        wv = std * jax.random.normal(keys[3], (d_model, d_attn), jnp.float32)
        layers.append(dict(
            ln1_g=jnp.ones((1, d_model), jnp.float32),
            ln1_b=jnp.zeros((1, d_model), jnp.float32),
            wqkv=jnp.concatenate([wq, wk, wv], axis=1).astype(jnp.bfloat16),
            bqkv=jnp.zeros((1, 3 * d_attn), jnp.float32),
            wo=(std * jax.random.normal(keys[4], (d_attn, d_model),
                                        jnp.float32)).astype(jnp.bfloat16),
            bo=jnp.zeros((1, d_model), jnp.float32),
            ln2_g=jnp.ones((1, d_model), jnp.float32),
            ln2_b=jnp.zeros((1, d_model), jnp.float32),
            w1=(std * jax.random.normal(keys[5], (d_model, d_ff),
                                        jnp.float32)).astype(jnp.bfloat16),
            b1=jnp.zeros((1, d_ff), jnp.float32),
            w2=(std * jax.random.normal(keys[6], (d_ff, d_model),
                                        jnp.float32)).astype(jnp.bfloat16),
            b2=jnp.zeros((1, d_model), jnp.float32),
        ))
    kout, _ = jax.random.split(key)
    return dict(
        layers=layers,
        wout=(std * jax.random.normal(kout, (d_model, vocab_size),
                                      jnp.float32)).astype(jnp.bfloat16),
        bout=jnp.zeros((1, vocab_size), jnp.float32),
    )


@functools.partial(jax.jit, static_argnums=(3, 4))
def transformer_forward(params, embed, pad_mask, n_heads, d_head):
    B, T, D = embed.shape
    x2d = embed.reshape(B * T, D).astype(jnp.float32)
    pad_f32 = pad_mask.astype(jnp.float32)
    for lp in params["layers"]:
        x2d = attention_block(x2d, pad_f32, lp, B, T, n_heads, d_head)
        x2d = mlp_block(x2d, lp)
    logits = vocab_projection(x2d, params["wout"], params["bout"])
    return logits.reshape(B, T, -1)


# --------------------------------------------------------------------------- #
# Pure-JAX reference (mirrors the kernel's bf16-matmul / f32-accumulate math)
# --------------------------------------------------------------------------- #
def _ref_ln(x, g, b, eps=1e-5):
    mu = jnp.mean(x, axis=-1, keepdims=True)
    var = jnp.mean(jnp.square(x - mu), axis=-1, keepdims=True)
    return (x - mu) * jax.lax.rsqrt(var + eps) * g + b


def reference_forward(params, embed, pad_mask, n_heads, d_head):
    B, T, D = embed.shape
    H, Dh = n_heads, d_head
    Da = H * Dh
    bf = lambda a: a.astype(jnp.bfloat16)

    def mm(a, w):
        return jnp.dot(bf(a), bf(w), preferred_element_type=jnp.float32)

    causal = jnp.tril(jnp.ones((T, T), dtype=bool))
    allowed = causal[None, None, :, :] & pad_mask[:, None, None, :]
    bias = jnp.where(allowed, 0.0, NEG_INF).astype(jnp.float32)

    x = embed.reshape(B * T, D).astype(jnp.float32)
    for p in params["layers"]:
        h = _ref_ln(x, p["ln1_g"], p["ln1_b"])
        qkv = mm(h, p["wqkv"]) + p["bqkv"]
        q = qkv[:, :Da].reshape(B, T, H, Dh).transpose(0, 2, 1, 3)
        k = qkv[:, Da:2 * Da].reshape(B, T, H, Dh).transpose(0, 2, 1, 3)
        v = qkv[:, 2 * Da:].reshape(B, T, H, Dh).transpose(0, 2, 1, 3)
        s = jnp.einsum("bhqd,bhkd->bhqk", bf(q), bf(k),
                       preferred_element_type=jnp.float32) / math.sqrt(Dh)
        s = s + bias
        pw = jax.nn.softmax(s, axis=-1)
        a = jnp.einsum("bhqk,bhkd->bhqd", bf(pw), bf(v),
                       preferred_element_type=jnp.float32)
        a = a.transpose(0, 2, 1, 3).reshape(B * T, Da)
        x = x + mm(a, p["wo"]) + p["bo"]
        h2 = _ref_ln(x, p["ln2_g"], p["ln2_b"])
        m = jax.nn.gelu(mm(h2, p["w1"]) + p["b1"], approximate=True)
        x = x + mm(m, p["w2"]) + p["b2"]
    logits = mm(x, params["wout"]) + params["bout"]
    return logits.reshape(B, T, -1)


# --------------------------------------------------------------------------- #
if __name__ == "__main__":
    vocab_size, n_layers, n_heads, n_ctx, d_model, d_head = 64, 2, 4, 8, 32, 8
    batch = 2

    key = jax.random.PRNGKey(0)
    kp, ke = jax.random.split(key)
    params = init_params(kp, vocab_size, n_layers, n_heads, d_model, d_head)

    embed = jax.random.normal(ke, (batch, n_ctx, d_model), jnp.float32)
    # batch 0: all real tokens; batch 1: last two positions are padding.
    pad_mask = jnp.array(
        [[True] * n_ctx, [True] * (n_ctx - 2) + [False, False]], dtype=bool
    )

    logits = transformer_forward(params, embed, pad_mask, n_heads, d_head)
    logits = jax.block_until_ready(logits)
    assert logits.shape == (batch, n_ctx, vocab_size), logits.shape

    ref = reference_forward(params, embed, pad_mask, n_heads, d_head)
    # Tolerance covers MXU vs XLA accumulation order + approx reciprocal in softmax.
    err = float(jnp.max(jnp.abs(logits - ref)))
    assert err < 1e-2, err

    print("KERNEL_OK")
</pallas_src>

<mosaic_0001>
module attributes {stable_mosaic.version = 11 : i64} {
  func.func @_mlp_block_kernel(%arg0: memref<16x32xf32, #tpu.memory_space<vmem>>, %arg1: memref<1x32xf32, #tpu.memory_space<vmem>>, %arg2: memref<1x32xf32, #tpu.memory_space<vmem>>, %arg3: memref<32x128xbf16, #tpu.memory_space<vmem>>, %arg4: memref<1x128xf32, #tpu.memory_space<vmem>>, %arg5: memref<128x32xbf16, #tpu.memory_space<vmem>>, %arg6: memref<1x32xf32, #tpu.memory_space<vmem>>, %arg7: memref<16x32xf32, #tpu.memory_space<vmem>>) attributes {dimension_semantics = [], scalar_prefetch = 0 : i64, scratch_operands = 0 : i64, tpu.core_type = #tpu.core_type<tc>} {
    %c0 = arith.constant 0 : index
    %c0_0 = arith.constant 0 : index
    %0 = vector.load %arg0[%c0, %c0_0] : memref<16x32xf32, #tpu.memory_space<vmem>>, vector<16x32xf32>
    %c0_1 = arith.constant 0 : index
    %c0_2 = arith.constant 0 : index
    %1 = vector.load %arg1[%c0_1, %c0_2] : memref<1x32xf32, #tpu.memory_space<vmem>>, vector<1x32xf32>
    %c0_3 = arith.constant 0 : index
    %c0_4 = arith.constant 0 : index
    %2 = vector.load %arg2[%c0_3, %c0_4] : memref<1x32xf32, #tpu.memory_space<vmem>>, vector<1x32xf32>
    %cst = arith.constant dense<0.000000e+00> : vector<16xf32>
    %3 = vector.multi_reduction <add>, %0, %cst [1] : vector<16x32xf32> to vector<16xf32>
    %4 = vector.shape_cast %3 : vector<16xf32> to vector<16x1xf32>
    %cst_5 = arith.constant 3.200000e+01 : f32
    %5 = vector.broadcast %cst_5 : f32 to vector<16x1xf32>
    %6 = arith.divf %4, %5 : vector<16x1xf32>
    %7 = vector.broadcast %6 : vector<16x1xf32> to vector<16x32xf32>
    %8 = arith.subf %0, %7 : vector<16x32xf32>
    %9 = arith.mulf %8, %8 : vector<16x32xf32>
    %cst_6 = arith.constant dense<0.000000e+00> : vector<16xf32>
    %10 = vector.multi_reduction <add>, %9, %cst_6 [1] : vector<16x32xf32> to vector<16xf32>
    %11 = vector.shape_cast %10 : vector<16xf32> to vector<16x1xf32>
    %cst_7 = arith.constant 3.200000e+01 : f32
    %12 = vector.broadcast %cst_7 : f32 to vector<16x1xf32>
    %13 = arith.divf %11, %12 : vector<16x1xf32>
    %14 = vector.broadcast %6 : vector<16x1xf32> to vector<16x32xf32>
    %15 = arith.subf %0, %14 : vector<16x32xf32>
    %cst_8 = arith.constant 9.99999974E-6 : f32
    %16 = vector.broadcast %cst_8 : f32 to vector<16x1xf32>
    %17 = arith.addf %13, %16 : vector<16x1xf32>
    %18 = math.rsqrt %17 : vector<16x1xf32>
    %19 = vector.broadcast %18 : vector<16x1xf32> to vector<16x32xf32>
    %20 = arith.mulf %15, %19 : vector<16x32xf32>
    %21 = vector.broadcast %1 : vector<1x32xf32> to vector<16x32xf32>
    %22 = arith.mulf %20, %21 : vector<16x32xf32>
    %23 = vector.broadcast %2 : vector<1x32xf32> to vector<16x32xf32>
    %24 = arith.addf %22, %23 : vector<16x32xf32>
    %25 = arith.truncf %24 : vector<16x32xf32> to vector<16x32xbf16>
    %c0_9 = arith.constant 0 : index
    %c0_10 = arith.constant 0 : index
    %26 = vector.load %arg3[%c0_9, %c0_10] : memref<32x128xbf16, #tpu.memory_space<vmem>>, vector<32x128xbf16>
    %cst_11 = arith.constant dense<0.000000e+00> : vector<16x128xf32>
    %27 = tpu.matmul %25, %26, %cst_11 {dimension_numbers = #tpu.dot_dimension_numbers<[1], [0], [0], [1], [0, 0, 1, 1], [], []>} : vector<16x32xbf16>, vector<32x128xbf16>, vector<16x128xf32> -> vector<16x128xf32>
    %c0_12 = arith.constant 0 : index
    %c0_13 = arith.constant 0 : index
    %28 = vector.load %arg4[%c0_12, %c0_13] : memref<1x128xf32, #tpu.memory_space<vmem>>, vector<1x128xf32>
    %29 = vector.broadcast %28 : vector<1x128xf32> to vector<16x128xf32>
    %30 = arith.addf %27, %29 : vector<16x128xf32>
    %31 = arith.mulf %30, %30 : vector<16x128xf32>
    %32 = arith.mulf %30, %31 : vector<16x128xf32>
    %cst_14 = arith.constant 4.471500e-02 : f32
    %33 = vector.broadcast %cst_14 : f32 to vector<16x128xf32>
    %34 = arith.mulf %33, %32 : vector<16x128xf32>
    %35 = arith.addf %30, %34 : vector<16x128xf32>
    %cst_15 = arith.constant 0.797884583 : f32
    %36 = vector.broadcast %cst_15 : f32 to vector<16x128xf32>
    %37 = arith.mulf %36, %35 : vector<16x128xf32>
    %38 = math.tanh %37 : vector<16x128xf32>
    %cst_16 = arith.constant 1.000000e+00 : f32
    %39 = vector.broadcast %cst_16 : f32 to vector<16x128xf32>
    %40 = arith.addf %39, %38 : vector<16x128xf32>
    %cst_17 = arith.constant 5.000000e-01 : f32
    %41 = vector.broadcast %cst_17 : f32 to vector<16x128xf32>
    %42 = arith.mulf %41, %40 : vector<16x128xf32>
    %43 = arith.mulf %30, %42 : vector<16x128xf32>
    %44 = arith.truncf %43 : vector<16x128xf32> to vector<16x128xbf16>
    %c0_18 = arith.constant 0 : index
    %c0_19 = arith.constant 0 : index
    %45 = vector.load %arg5[%c0_18, %c0_19] : memref<128x32xbf16, #tpu.memory_space<vmem>>, vector<128x32xbf16>
    %cst_20 = arith.constant dense<0.000000e+00> : vector<16x32xf32>
    %46 = tpu.matmul %44, %45, %cst_20 {dimension_numbers = #tpu.dot_dimension_numbers<[1], [0], [0], [1], [0, 0, 1, 1], [], []>} : vector<16x128xbf16>, vector<128x32xbf16>, vector<16x32xf32> -> vector<16x32xf32>
    %c0_21 = arith.constant 0 : index
    %c0_22 = arith.constant 0 : index
    %47 = vector.load %arg6[%c0_21, %c0_22] : memref<1x32xf32, #tpu.memory_space<vmem>>, vector<1x32xf32>
    %48 = vector.broadcast %47 : vector<1x32xf32> to vector<16x32xf32>
    %49 = arith.addf %46, %48 : vector<16x32xf32>
    %50 = arith.addf %0, %49 : vector<16x32xf32>
    %c0_23 = arith.constant 0 : index
    %c0_24 = arith.constant 0 : index
    %51 = vector.load %arg7[%c0_23, %c0_24] : memref<16x32xf32, #tpu.memory_space<vmem>>, vector<16x32xf32>
    tpu.vector_store %arg7[%c0_23, %c0_24], %50 {strides = array<i32>} : memref<16x32xf32, #tpu.memory_space<vmem>>, vector<16x32xf32>,
    return
  }
}

module attributes {stable_mosaic.version = 11 : i64} {
  func.func @_attn_block_kernel(%arg0: memref<16x32xf32, #tpu.memory_space<vmem>>, %arg1: memref<2x8xf32, #tpu.memory_space<vmem>>, %arg2: memref<1x32xf32, #tpu.memory_space<vmem>>, %arg3: memref<1x32xf32, #tpu.memory_space<vmem>>, %arg4: memref<32x96xbf16, #tpu.memory_space<vmem>>, %arg5: memref<1x96xf32, #tpu.memory_space<vmem>>, %arg6: memref<32x32xbf16, #tpu.memory_space<vmem>>, %arg7: memref<1x32xf32, #tpu.memory_space<vmem>>, %arg8: memref<16x32xf32, #tpu.memory_space<vmem>>) attributes {dimension_semantics = [], scalar_prefetch = 0 : i64, scratch_operands = 0 : i64, tpu.core_type = #tpu.core_type<tc>} {
    %c0 = arith.constant 0 : index
    %c0_0 = arith.constant 0 : index
    %0 = vector.load %arg0[%c0, %c0_0] : memref<16x32xf32, #tpu.memory_space<vmem>>, vector<16x32xf32>
    %c0_1 = arith.constant 0 : index
    %c0_2 = arith.constant 0 : index
    %1 = vector.load %arg2[%c0_1, %c0_2] : memref<1x32xf32, #tpu.memory_space<vmem>>, vector<1x32xf32>
    %c0_3 = arith.constant 0 : index
    %c0_4 = arith.constant 0 : index
    %2 = vector.load %arg3[%c0_3, %c0_4] : memref<1x32xf32, #tpu.memory_space<vmem>>, vector<1x32xf32>
    %cst = arith.constant dense<0.000000e+00> : vector<16xf32>
    %3 = vector.multi_reduction <add>, %0, %cst [1] : vector<16x32xf32> to vector<16xf32>
    %4 = vector.shape_cast %3 : vector<16xf32> to vector<16x1xf32>
    %cst_5 = arith.constant 3.200000e+01 : f32
    %5 = vector.broadcast %cst_5 : f32 to vector<16x1xf32>
    %6 = arith.divf %4, %5 : vector<16x1xf32>
    %7 = vector.broadcast %6 : vector<16x1xf32> to vector<16x32xf32>
    %8 = arith.subf %0, %7 : vector<16x32xf32>
    %9 = arith.mulf %8, %8 : vector<16x32xf32>
    %cst_6 = arith.constant dense<0.000000e+00> : vector<16xf32>
    %10 = vector.multi_reduction <add>, %9, %cst_6 [1] : vector<16x32xf32> to vector<16xf32>
    %11 = vector.shape_cast %10 : vector<16xf32> to vector<16x1xf32>
    %cst_7 = arith.constant 3.200000e+01 : f32
    %12 = vector.broadcast %cst_7 : f32 to vector<16x1xf32>
    %13 = arith.divf %11, %12 : vector<16x1xf32>
    %14 = vector.broadcast %6 : vector<16x1xf32> to vector<16x32xf32>
    %15 = arith.subf %0, %14 : vector<16x32xf32>
    %cst_8 = arith.constant 9.99999974E-6 : f32
    %16 = vector.broadcast %cst_8 : f32 to vector<16x1xf32>
    %17 = arith.addf %13, %16 : vector<16x1xf32>
    %18 = math.rsqrt %17 : vector<16x1xf32>
    %19 = vector.broadcast %18 : vector<16x1xf32> to vector<16x32xf32>
    %20 = arith.mulf %15, %19 : vector<16x32xf32>
    %21 = vector.broadcast %1 : vector<1x32xf32> to vector<16x32xf32>
    %22 = arith.mulf %20, %21 : vector<16x32xf32>
    %23 = vector.broadcast %2 : vector<1x32xf32> to vector<16x32xf32>
    %24 = arith.addf %22, %23 : vector<16x32xf32>
    %25 = arith.truncf %24 : vector<16x32xf32> to vector<16x32xbf16>
    %c0_9 = arith.constant 0 : index
    %c0_10 = arith.constant 0 : index
    %26 = vector.load %arg4[%c0_9, %c0_10] : memref<32x96xbf16, #tpu.memory_space<vmem>>, vector<32x96xbf16>
    %cst_11 = arith.constant dense<0.000000e+00> : vector<16x96xf32>
    %27 = tpu.matmul %25, %26, %cst_11 {dimension_numbers = #tpu.dot_dimension_numbers<[1], [0], [0], [1], [0, 0, 1, 1], [], []>} : vector<16x32xbf16>, vector<32x96xbf16>, vector<16x96xf32> -> vector<16x96xf32>
    %c0_12 = arith.constant 0 : index
    %c0_13 = arith.constant 0 : index
    %28 = vector.load %arg5[%c0_12, %c0_13] : memref<1x96xf32, #tpu.memory_space<vmem>>, vector<1x96xf32>
    %29 = vector.broadcast %28 : vector<1x96xf32> to vector<16x96xf32>
    %30 = arith.addf %27, %29 : vector<16x96xf32>
    %31 = tpu.iota {dimensions = array<i32: 0>} : vector<8x8xi32>
    %32 = tpu.iota {dimensions = array<i32: 1>} : vector<8x8xi32>
    %33 = arith.cmpi sge, %31, %32 : vector<8x8xi32>
    %c0_14 = arith.constant 0 : index
    %c0_15 = arith.constant 0 : index
    %34 = vector.load %arg1[%c0_14, %c0_15] : memref<2x8xf32, #tpu.memory_space<vmem>>, vector<2x8xf32>
    %cst_16 = arith.constant 5.000000e-01 : f32
    %35 = vector.broadcast %cst_16 : f32 to vector<2x8xf32>
    %36 = arith.cmpf ogt, %34, %35 : vector<2x8xf32>
    %37 = vector.shape_cast %33 : vector<8x8xi1> to vector<1x8x8xi1>
    %38 = vector.shape_cast %36 : vector<2x8xi1> to vector<2x1x8xi1>
    %39 = vector.broadcast %37 : vector<1x8x8xi1> to vector<2x8x8xi1>
    %40 = vector.broadcast %38 : vector<2x1x8xi1> to vector<2x8x8xi1>
    %41 = arith.andi %39, %40 : vector<2x8x8xi1>
    %cst_17 = arith.constant 0.000000e+00 : f32
    %cst_18 = arith.constant -1.000000e+09 : f32
    %42 = vector.broadcast %cst_17 : f32 to vector<2x8x8xf32>
    %43 = vector.broadcast %cst_18 : f32 to vector<2x8x8xf32>
    %44 = arith.select %41, %42, %43 : vector<2x8x8xi1>, vector<2x8x8xf32>
    %cst_19 = arith.constant 0.000000e+00 : f32
    %45 = vector.broadcast %cst_19 : f32 to vector<16x32xf32>
    %46 = vector.extract_strided_slice %30 {offsets = [0, 0], sizes = [16, 8], strides = [1, 1]} : vector<16x96xf32> to vector<16x8xf32>
    %47 = vector.shape_cast %46 : vector<16x8xf32> to vector<2x8x8xf32>
    %48 = vector.extract_strided_slice %30 {offsets = [0, 32], sizes = [16, 8], strides = [1, 1]} : vector<16x96xf32> to vector<16x8xf32>
    %49 = vector.shape_cast %48 : vector<16x8xf32> to vector<2x8x8xf32>
    %50 = vector.extract_strided_slice %30 {offsets = [0, 64], sizes = [16, 8], strides = [1, 1]} : vector<16x96xf32> to vector<16x8xf32>
    %51 = vector.shape_cast %50 : vector<16x8xf32> to vector<2x8x8xf32>
    %52 = arith.truncf %47 : vector<2x8x8xf32> to vector<2x8x8xbf16>
    %53 = arith.truncf %49 : vector<2x8x8xf32> to vector<2x8x8xbf16>
    "tpu.trace_start"() <{level = 10 : i32, message = "bqd,bkd->bqk"}> : () -> ()
    %cst_20 = arith.constant dense<0.000000e+00> : vector<2x8x8xf32>
    %54 = tpu.matmul %52, %53, %cst_20 {dimension_numbers = #tpu.dot_dimension_numbers<[2], [2], [1], [1], [0, 0, 0, 1, 1, 1], [0], [0]>} : vector<2x8x8xbf16>, vector<2x8x8xbf16>, vector<2x8x8xf32> -> vector<2x8x8xf32>
    "tpu.trace_stop"() : () -> ()
    %cst_21 = arith.constant 0.353553385 : f32
    %55 = vector.broadcast %cst_21 : f32 to vector<2x8x8xf32>
    %56 = arith.mulf %54, %55 : vector<2x8x8xf32>
    %57 = arith.addf %56, %44 : vector<2x8x8xf32>
    %cst_22 = arith.constant dense<0xFF800000> : vector<2x8xf32>
    %58 = vector.multi_reduction <maximumf>, %57, %cst_22 [2] : vector<2x8x8xf32> to vector<2x8xf32>
    %59 = vector.shape_cast %58 : vector<2x8xf32> to vector<2x8x1xf32>
    %60 = vector.broadcast %59 : vector<2x8x1xf32> to vector<2x8x8xf32>
    %61 = arith.subf %57, %60 : vector<2x8x8xf32>
    %62 = math.exp %61 : vector<2x8x8xf32>
    %cst_23 = arith.constant dense<0.000000e+00> : vector<2x8xf32>
    %63 = vector.multi_reduction <add>, %62, %cst_23 [2] : vector<2x8x8xf32> to vector<2x8xf32>
    %64 = vector.shape_cast %63 : vector<2x8xf32> to vector<2x8x1xf32>
    %65 = tpu.reciprocal %64 {approx = true} : vector<2x8x1xf32> -> vector<2x8x1xf32>
    %66 = vector.broadcast %65 : vector<2x8x1xf32> to vector<2x8x8xf32>
    %67 = arith.mulf %62, %66 : vector<2x8x8xf32>
    %68 = arith.truncf %67 : vector<2x8x8xf32> to vector<2x8x8xbf16>
    %69 = arith.truncf %51 : vector<2x8x8xf32> to vector<2x8x8xbf16>
    "tpu.trace_start"() <{level = 10 : i32, message = "bqk,bkd->bqd"}> : () -> ()
    %cst_24 = arith.constant dense<0.000000e+00> : vector<2x8x8xf32>
    %70 = tpu.matmul %68, %69, %cst_24 {dimension_numbers = #tpu.dot_dimension_numbers<[2], [1], [1], [2], [0, 0, 0, 1, 1, 2], [0], [0]>} : vector<2x8x8xbf16>, vector<2x8x8xbf16>, vector<2x8x8xf32> -> vector<2x8x8xf32>
    "tpu.trace_stop"() : () -> ()
    %71 = vector.shape_cast %70 : vector<2x8x8xf32> to vector<16x8xf32>
    %72 = arith.truncf %71 : vector<16x8xf32> to vector<16x8xbf16>
    %c0_25 = arith.constant 0 : index
    %c0_26 = arith.constant 0 : index
    %73 = vector.load %arg6[%c0_25, %c0_26] : memref<32x32xbf16, #tpu.memory_space<vmem>>, vector<8x32xbf16>
    %cst_27 = arith.constant dense<0.000000e+00> : vector<16x32xf32>
    %74 = tpu.matmul %72, %73, %cst_27 {dimension_numbers = #tpu.dot_dimension_numbers<[1], [0], [0], [1], [0, 0, 1, 1], [], []>} : vector<16x8xbf16>, vector<8x32xbf16>, vector<16x32xf32> -> vector<16x32xf32>
    %75 = arith.addf %45, %74 : vector<16x32xf32>
    %76 = vector.extract_strided_slice %30 {offsets = [0, 8], sizes = [16, 8], strides = [1, 1]} : vector<16x96xf32> to vector<16x8xf32>
    %77 = vector.shape_cast %76 : vector<16x8xf32> to vector<2x8x8xf32>
    %78 = vector.extract_strided_slice %30 {offsets = [0, 40], sizes = [16, 8], strides = [1, 1]} : vector<16x96xf32> to vector<16x8xf32>
    %79 = vector.shape_cast %78 : vector<16x8xf32> to vector<2x8x8xf32>
    %80 = vector.extract_strided_slice %30 {offsets = [0, 72], sizes = [16, 8], strides = [1, 1]} : vector<16x96xf32> to vector<16x8xf32>
    %81 = vector.shape_cast %80 : vector<16x8xf32> to vector<2x8x8xf32>
    %82 = arith.truncf %77 : vector<2x8x8xf32> to vector<2x8x8xbf16>
    %83 = arith.truncf %79 : vector<2x8x8xf32> to vector<2x8x8xbf16>
    "tpu.trace_start"() <{level = 10 : i32, message = "bqd,bkd->bqk"}> : () -> ()
    %cst_28 = arith.constant dense<0.000000e+00> : vector<2x8x8xf32>
    %84 = tpu.matmul %82, %83, %cst_28 {dimension_numbers = #tpu.dot_dimension_numbers<[2], [2], [1], [1], [0, 0, 0, 1, 1, 1], [0], [0]>} : vector<2x8x8xbf16>, vector<2x8x8xbf16>, vector<2x8x8xf32> -> vector<2x8x8xf32>
    "tpu.trace_stop"() : () -> ()
    %cst_29 = arith.constant 0.353553385 : f32
    %85 = vector.broadcast %cst_29 : f32 to vector<2x8x8xf32>
    %86 = arith.mulf %84, %85 : vector<2x8x8xf32>
    %87 = arith.addf %86, %44 : vector<2x8x8xf32>
    %cst_30 = arith.constant dense<0xFF800000> : vector<2x8xf32>
    %88 = vector.multi_reduction <maximumf>, %87, %cst_30 [2] : vector<2x8x8xf32> to vector<2x8xf32>
    %89 = vector.shape_cast %88 : vector<2x8xf32> to vector<2x8x1xf32>
    %90 = vector.broadcast %89 : vector<2x8x1xf32> to vector<2x8x8xf32>
    %91 = arith.subf %87, %90 : vector<2x8x8xf32>
    %92 = math.exp %91 : vector<2x8x8xf32>
    %cst_31 = arith.constant dense<0.000000e+00> : vector<2x8xf32>
    %93 = vector.multi_reduction <add>, %92, %cst_31 [2] : vector<2x8x8xf32> to vector<2x8xf32>
    %94 = vector.shape_cast %93 : vector<2x8xf32> to vector<2x8x1xf32>
    %95 = tpu.reciprocal %94 {approx = true} : vector<2x8x1xf32> -> vector<2x8x1xf32>
    %96 = vector.broadcast %95 : vector<2x8x1xf32> to vector<2x8x8xf32>
    %97 = arith.mulf %92, %96 : vector<2x8x8xf32>
    %98 = arith.truncf %97 : vector<2x8x8xf32> to vector<2x8x8xbf16>
    %99 = arith.truncf %81 : vector<2x8x8xf32> to vector<2x8x8xbf16>
    "tpu.trace_start"() <{level = 10 : i32, message = "bqk,bkd->bqd"}> : () -> ()
    %cst_32 = arith.constant dense<0.000000e+00> : vector<2x8x8xf32>
    %100 = tpu.matmul %98, %99, %cst_32 {dimension_numbers = #tpu.dot_dimension_numbers<[2], [1], [1], [2], [0, 0, 0, 1, 1, 2], [0], [0]>} : vector<2x8x8xbf16>, vector<2x8x8xbf16>, vector<2x8x8xf32> -> vector<2x8x8xf32>
    "tpu.trace_stop"() : () -> ()
    %101 = vector.shape_cast %100 : vector<2x8x8xf32> to vector<16x8xf32>
    %102 = arith.truncf %101 : vector<16x8xf32> to vector<16x8xbf16>
    %c8 = arith.constant 8 : index
    %c0_33 = arith.constant 0 : index
    %103 = vector.load %arg6[%c8, %c0_33] : memref<32x32xbf16, #tpu.memory_space<vmem>>, vector<8x32xbf16>
    %cst_34 = arith.constant dense<0.000000e+00> : vector<16x32xf32>
    %104 = tpu.matmul %102, %103, %cst_34 {dimension_numbers = #tpu.dot_dimension_numbers<[1], [0], [0], [1], [0, 0, 1, 1], [], []>} : vector<16x8xbf16>, vector<8x32xbf16>, vector<16x32xf32> -> vector<16x32xf32>
    %105 = arith.addf %75, %104 : vector<16x32xf32>
    %106 = vector.extract_strided_slice %30 {offsets = [0, 16], sizes = [16, 8], strides = [1, 1]} : vector<16x96xf32> to vector<16x8xf32>
    %107 = vector.shape_cast %106 : vector<16x8xf32> to vector<2x8x8xf32>
    %108 = vector.extract_strided_slice %30 {offsets = [0, 48], sizes = [16, 8], strides = [1, 1]} : vector<16x96xf32> to vector<16x8xf32>
    %109 = vector.shape_cast %108 : vector<16x8xf32> to vector<2x8x8xf32>
    %110 = vector.extract_strided_slice %30 {offsets = [0, 80], sizes = [16, 8], strides = [1, 1]} : vector<16x96xf32> to vector<16x8xf32>
    %111 = vector.shape_cast %110 : vector<16x8xf32> to vector<2x8x8xf32>
    %112 = arith.truncf %107 : vector<2x8x8xf32> to vector<2x8x8xbf16>
    %113 = arith.truncf %109 : vector<2x8x8xf32> to vector<2x8x8xbf16>
    "tpu.trace_start"() <{level = 10 : i32, message = "bqd,bkd->bqk"}> : () -> ()
    %cst_35 = arith.constant dense<0.000000e+00> : vector<2x8x8xf32>
    %114 = tpu.matmul %112, %113, %cst_35 {dimension_numbers = #tpu.dot_dimension_numbers<[2], [2], [1], [1], [0, 0, 0, 1, 1, 1], [0], [0]>} : vector<2x8x8xbf16>, vector<2x8x8xbf16>, vector<2x8x8xf32> -> vector<2x8x8xf32>
    "tpu.trace_stop"() : () -> ()
    %cst_36 = arith.constant 0.353553385 : f32
    %115 = vector.broadcast %cst_36 : f32 to vector<2x8x8xf32>
    %116 = arith.mulf %114, %115 : vector<2x8x8xf32>
    %117 = arith.addf %116, %44 : vector<2x8x8xf32>
    %cst_37 = arith.constant dense<0xFF800000> : vector<2x8xf32>
    %118 = vector.multi_reduction <maximumf>, %117, %cst_37 [2] : vector<2x8x8xf32> to vector<2x8xf32>
    %119 = vector.shape_cast %118 : vector<2x8xf32> to vector<2x8x1xf32>
    %120 = vector.broadcast %119 : vector<2x8x1xf32> to vector<2x8x8xf32>
    %121 = arith.subf %117, %120 : vector<2x8x8xf32>
    %122 = math.exp %121 : vector<2x8x8xf32>
    %cst_38 = arith.constant dense<0.000000e+00> : vector<2x8xf32>
    %123 = vector.multi_reduction <add>, %122, %cst_38 [2] : vector<2x8x8xf32> to vector<2x8xf32>
    %124 = vector.shape_cast %123 : vector<2x8xf32> to vector<2x8x1xf32>
    %125 = tpu.reciprocal %124 {approx = true} : vector<2x8x1xf32> -> vector<2x8x1xf32>
    %126 = vector.broadcast %125 : vector<2x8x1xf32> to vector<2x8x8xf32>
    %127 = arith.mulf %122, %126 : vector<2x8x8xf32>
    %128 = arith.truncf %127 : vector<2x8x8xf32> to vector<2x8x8xbf16>
    %129 = arith.truncf %111 : vector<2x8x8xf32> to vector<2x8x8xbf16>
    "tpu.trace_start"() <{level = 10 : i32, message = "bqk,bkd->bqd"}> : () -> ()
    %cst_39 = arith.constant dense<0.000000e+00> : vector<2x8x8xf32>
    %130 = tpu.matmul %128, %129, %cst_39 {dimension_numbers = #tpu.dot_dimension_numbers<[2], [1], [1], [2], [0, 0, 0, 1, 1, 2], [0], [0]>} : vector<2x8x8xbf16>, vector<2x8x8xbf16>, vector<2x8x8xf32> -> vector<2x8x8xf32>
    "tpu.trace_stop"() : () -> ()
    %131 = vector.shape_cast %130 : vector<2x8x8xf32> to vector<16x8xf32>
    %132 = arith.truncf %131 : vector<16x8xf32> to vector<16x8xbf16>
    %c16 = arith.constant 16 : index
    %c0_40 = arith.constant 0 : index
    %133 = vector.load %arg6[%c16, %c0_40] : memref<32x32xbf16, #tpu.memory_space<vmem>>, vector<8x32xbf16>
    %cst_41 = arith.constant dense<0.000000e+00> : vector<16x32xf32>
    %134 = tpu.matmul %132, %133, %cst_41 {dimension_numbers = #tpu.dot_dimension_numbers<[1], [0], [0], [1], [0, 0, 1, 1], [], []>} : vector<16x8xbf16>, vector<8x32xbf16>, vector<16x32xf32> -> vector<16x32xf32>
    %135 = arith.addf %105, %134 : vector<16x32xf32>
    %136 = vector.extract_strided_slice %30 {offsets = [0, 24], sizes = [16, 8], strides = [1, 1]} : vector<16x96xf32> to vector<16x8xf32>
    %137 = vector.shape_cast %136 : vector<16x8xf32> to vector<2x8x8xf32>
    %138 = vector.extract_strided_slice %30 {offsets = [0, 56], sizes = [16, 8], strides = [1, 1]} : vector<16x96xf32> to vector<16x8xf32>
    %139 = vector.shape_cast %138 : vector<16x8xf32> to vector<2x8x8xf32>
    %140 = vector.extract_strided_slice %30 {offsets = [0, 88], sizes = [16, 8], strides = [1, 1]} : vector<16x96xf32> to vector<16x8xf32>
    %141 = vector.shape_cast %140 : vector<16x8xf32> to vector<2x8x8xf32>
    %142 = arith.truncf %137 : vector<2x8x8xf32> to vector<2x8x8xbf16>
    %143 = arith.truncf %139 : vector<2x8x8xf32> to vector<2x8x8xbf16>
    "tpu.trace_start"() <{level = 10 : i32, message = "bqd,bkd->bqk"}> : () -> ()
    %cst_42 = arith.constant dense<0.000000e+00> : vector<2x8x8xf32>
    %144 = tpu.matmul %142, %143, %cst_42 {dimension_numbers = #tpu.dot_dimension_numbers<[2], [2], [1], [1], [0, 0, 0, 1, 1, 1], [0], [0]>} : vector<2x8x8xbf16>, vector<2x8x8xbf16>, vector<2x8x8xf32> -> vector<2x8x8xf32>
    "tpu.trace_stop"() : () -> ()
    %cst_43 = arith.constant 0.353553385 : f32
    %145 = vector.broadcast %cst_43 : f32 to vector<2x8x8xf32>
    %146 = arith.mulf %144, %145 : vector<2x8x8xf32>
    %147 = arith.addf %146, %44 : vector<2x8x8xf32>
    %cst_44 = arith.constant dense<0xFF800000> : vector<2x8xf32>
    %148 = vector.multi_reduction <maximumf>, %147, %cst_44 [2] : vector<2x8x8xf32> to vector<2x8xf32>
    %149 = vector.shape_cast %148 : vector<2x8xf32> to vector<2x8x1xf32>
    %150 = vector.broadcast %149 : vector<2x8x1xf32> to vector<2x8x8xf32>
    %151 = arith.subf %147, %150 : vector<2x8x8xf32>
    %152 = math.exp %151 : vector<2x8x8xf32>
    %cst_45 = arith.constant dense<0.000000e+00> : vector<2x8xf32>
    %153 = vector.multi_reduction <add>, %152, %cst_45 [2] : vector<2x8x8xf32> to vector<2x8xf32>
    %154 = vector.shape_cast %153 : vector<2x8xf32> to vector<2x8x1xf32>
    %155 = tpu.reciprocal %154 {approx = true} : vector<2x8x1xf32> -> vector<2x8x1xf32>
    %156 = vector.broadcast %155 : vector<2x8x1xf32> to vector<2x8x8xf32>
    %157 = arith.mulf %152, %156 : vector<2x8x8xf32>
    %158 = arith.truncf %157 : vector<2x8x8xf32> to vector<2x8x8xbf16>
    %159 = arith.truncf %141 : vector<2x8x8xf32> to vector<2x8x8xbf16>
    "tpu.trace_start"() <{level = 10 : i32, message = "bqk,bkd->bqd"}> : () -> ()
    %cst_46 = arith.constant dense<0.000000e+00> : vector<2x8x8xf32>
    %160 = tpu.matmul %158, %159, %cst_46 {dimension_numbers = #tpu.dot_dimension_numbers<[2], [1], [1], [2], [0, 0, 0, 1, 1, 2], [0], [0]>} : vector<2x8x8xbf16>, vector<2x8x8xbf16>, vector<2x8x8xf32> -> vector<2x8x8xf32>
    "tpu.trace_stop"() : () -> ()
    %161 = vector.shape_cast %160 : vector<2x8x8xf32> to vector<16x8xf32>
    %162 = arith.truncf %161 : vector<16x8xf32> to vector<16x8xbf16>
    %c24 = arith.constant 24 : index
    %c0_47 = arith.constant 0 : index
    %163 = vector.load %arg6[%c24, %c0_47] : memref<32x32xbf16, #tpu.memory_space<vmem>>, vector<8x32xbf16>
    %cst_48 = arith.constant dense<0.000000e+00> : vector<16x32xf32>
    %164 = tpu.matmul %162, %163, %cst_48 {dimension_numbers = #tpu.dot_dimension_numbers<[1], [0], [0], [1], [0, 0, 1, 1], [], []>} : vector<16x8xbf16>, vector<8x32xbf16>, vector<16x32xf32> -> vector<16x32xf32>
    %165 = arith.addf %135, %164 : vector<16x32xf32>
    %166 = arith.addf %0, %165 : vector<16x32xf32>
    %c0_49 = arith.constant 0 : index
    %c0_50 = arith.constant 0 : index
    %167 = vector.load %arg7[%c0_49, %c0_50] : memref<1x32xf32, #tpu.memory_space<vmem>>, vector<1x32xf32>
    %168 = vector.broadcast %167 : vector<1x32xf32> to vector<16x32xf32>
    %169 = arith.addf %166, %168 : vector<16x32xf32>
    %c0_51 = arith.constant 0 : index
    %c0_52 = arith.constant 0 : index
    %170 = vector.load %arg8[%c0_51, %c0_52] : memref<16x32xf32, #tpu.memory_space<vmem>>, vector<16x32xf32>
    tpu.vector_store %arg8[%c0_51, %c0_52], %169 {strides = array<i32>} : memref<16x32xf32, #tpu.memory_space<vmem>>, vector<16x32xf32>,
    return
  }
}

module attributes {stable_mosaic.version = 11 : i64} {
  func.func @_vocab_proj_kernel(%arg0: i32, %arg1: i32, %arg2: i32, %arg3: memref<16x32xf32, #tpu.memory_space<vmem>>, %arg4: memref<32x64xbf16, #tpu.memory_space<vmem>>, %arg5: memref<1x64xf32, #tpu.memory_space<vmem>>, %arg6: memref<16x64xf32, #tpu.memory_space<vmem>>, %arg7: memref<16x64xf32, #tpu.memory_space<vmem>>) attributes {dimension_semantics = [#tpu.dimension_semantics<parallel>, #tpu.dimension_semantics<parallel>, #tpu.dimension_semantics<arbitrary>], iteration_bounds = array<i64: 1, 1, 1>, scalar_prefetch = 0 : i64, scratch_operands = 1 : i64, tpu.core_type = #tpu.core_type<tc>, window_params = [{transform_indices = @transform_0, window_bounds = array<i64: 16, 32>}, {transform_indices = @transform_1, window_bounds = array<i64: 32, 64>}, {transform_indices = @transform_2, window_bounds = array<i64: 1, 64>}, {transform_indices = @transform_3, window_bounds = array<i64: 16, 64>}]} {
    %c0_i32 = arith.constant 0 : i32
    %0 = arith.cmpi eq, %arg2, %c0_i32 : i32
    %1 = arith.extui %0 : i1 to i32
    %c0_i32_0 = arith.constant 0 : i32
    %2 = arith.cmpi ne, %1, %c0_i32_0 : i32
    scf.if %2 {
      %cst_10 = arith.constant 0.000000e+00 : f32
      %13 = vector.broadcast %cst_10 : f32 to vector<16x64xf32>
      %c0_11 = arith.constant 0 : index
      %c0_12 = arith.constant 0 : index
      %14 = vector.load %arg7[%c0_11, %c0_12] : memref<16x64xf32, #tpu.memory_space<vmem>>, vector<16x64xf32>
      tpu.vector_store %arg7[%c0_11, %c0_12], %13 {strides = array<i32>} : memref<16x64xf32, #tpu.memory_space<vmem>>, vector<16x64xf32>,
    } else {
    }
    %c0 = arith.constant 0 : index
    %c0_1 = arith.constant 0 : index
    %3 = vector.load %arg7[%c0, %c0_1] : memref<16x64xf32, #tpu.memory_space<vmem>>, vector<16x64xf32>
    %c0_2 = arith.constant 0 : index
    %c0_3 = arith.constant 0 : index
    %4 = vector.load %arg3[%c0_2, %c0_3] : memref<16x32xf32, #tpu.memory_space<vmem>>, vector<16x32xf32>
    %5 = arith.truncf %4 : vector<16x32xf32> to vector<16x32xbf16>
    %c0_4 = arith.constant 0 : index
    %c0_5 = arith.constant 0 : index
    %6 = vector.load %arg4[%c0_4, %c0_5] : memref<32x64xbf16, #tpu.memory_space<vmem>>, vector<32x64xbf16>
    %cst = arith.constant dense<0.000000e+00> : vector<16x64xf32>
    %7 = tpu.matmul %5, %6, %cst {dimension_numbers = #tpu.dot_dimension_numbers<[1], [0], [0], [1], [0, 0, 1, 1], [], []>} : vector<16x32xbf16>, vector<32x64xbf16>, vector<16x64xf32> -> vector<16x64xf32>
    %8 = arith.addf %3, %7 : vector<16x64xf32>
    %c0_6 = arith.constant 0 : index
    %c0_7 = arith.constant 0 : index
    %9 = vector.load %arg7[%c0_6, %c0_7] : memref<16x64xf32, #tpu.memory_space<vmem>>, vector<16x64xf32>
    tpu.vector_store %arg7[%c0_6, %c0_7], %8 {strides = array<i32>} : memref<16x64xf32, #tpu.memory_space<vmem>>, vector<16x64xf32>,
    %c0_i32_8 = arith.constant 0 : i32
    %10 = arith.cmpi eq, %arg2, %c0_i32_8 : i32
    %11 = arith.extui %10 : i1 to i32
    %c0_i32_9 = arith.constant 0 : i32
    %12 = arith.cmpi ne, %11, %c0_i32_9 : i32
    scf.if %12 {
      %c0_10 = arith.constant 0 : index
      %c0_11 = arith.constant 0 : index
      %13 = vector.load %arg7[%c0_10, %c0_11] : memref<16x64xf32, #tpu.memory_space<vmem>>, vector<16x64xf32>
      %c0_12 = arith.constant 0 : index
      %c0_13 = arith.constant 0 : index
      %14 = vector.load %arg5[%c0_12, %c0_13] : memref<1x64xf32, #tpu.memory_space<vmem>>, vector<1x64xf32>
      %15 = vector.broadcast %14 : vector<1x64xf32> to vector<16x64xf32>
      %16 = arith.addf %13, %15 : vector<16x64xf32>
      %c0_14 = arith.constant 0 : index
      %c0_15 = arith.constant 0 : index
      %17 = vector.load %arg6[%c0_14, %c0_15] : memref<16x64xf32, #tpu.memory_space<vmem>>, vector<16x64xf32>
      tpu.vector_store %arg6[%c0_14, %c0_15], %16 {strides = array<i32>} : memref<16x64xf32, #tpu.memory_space<vmem>>, vector<16x64xf32>,
    } else {
    }
    return
  }
  func.func @transform_0(%arg0: i32, %arg1: i32, %arg2: i32) -> (i32, i32) {
    %c0_i32 = arith.constant 0 : i32
    return %arg0, %arg2 : i32, i32
  }
  func.func @transform_1(%arg0: i32, %arg1: i32, %arg2: i32) -> (i32, i32) {
    %c0_i32 = arith.constant 0 : i32
    return %arg2, %arg1 : i32, i32
  }
  func.func @transform_2(%arg0: i32, %arg1: i32, %arg2: i32) -> (i32, i32) {
    %c0_i32 = arith.constant 0 : i32
    %c0_i32_0 = arith.constant 0 : i32
    return %c0_i32, %arg1 : i32, i32
  }
  func.func @transform_3(%arg0: i32, %arg1: i32, %arg2: i32) -> (i32, i32) {
    %c0_i32 = arith.constant 0 : i32
    return %arg0, %arg1 : i32, i32
  }
}

module attributes {stable_mosaic.version = 11 : i64} {
  func.func @_attn_block_kernel(%arg0: memref<16x32xf32, #tpu.memory_space<vmem>>, %arg1: memref<2x8xf32, #tpu.memory_space<vmem>>, %arg2: memref<1x32xf32, #tpu.memory_space<vmem>>, %arg3: memref<1x32xf32, #tpu.memory_space<vmem>>, %arg4: memref<32x96xbf16, #tpu.memory_space<vmem>>, %arg5: memref<1x96xf32, #tpu.memory_space<vmem>>, %arg6: memref<32x32xbf16, #tpu.memory_space<vmem>>, %arg7: memref<1x32xf32, #tpu.memory_space<vmem>>, %arg8: memref<16x32xf32, #tpu.memory_space<vmem>>) attributes {dimension_semantics = [], scalar_prefetch = 0 : i64, scratch_operands = 0 : i64, tpu.core_type = #tpu.core_type<tc>} {
    %c0 = arith.constant 0 : index
    %c0_0 = arith.constant 0 : index
    %0 = vector.load %arg0[%c0, %c0_0] : memref<16x32xf32, #tpu.memory_space<vmem>>, vector<16x32xf32>
    %c0_1 = arith.constant 0 : index
    %c0_2 = arith.constant 0 : index
    %1 = vector.load %arg2[%c0_1, %c0_2] : memref<1x32xf32, #tpu.memory_space<vmem>>, vector<1x32xf32>
    %c0_3 = arith.constant 0 : index
    %c0_4 = arith.constant 0 : index
    %2 = vector.load %arg3[%c0_3, %c0_4] : memref<1x32xf32, #tpu.memory_space<vmem>>, vector<1x32xf32>
    %cst = arith.constant dense<0.000000e+00> : vector<16xf32>
    %3 = vector.multi_reduction <add>, %0, %cst [1] : vector<16x32xf32> to vector<16xf32>
    %4 = vector.shape_cast %3 : vector<16xf32> to vector<16x1xf32>
    %cst_5 = arith.constant 3.200000e+01 : f32
    %5 = vector.broadcast %cst_5 : f32 to vector<16x1xf32>
    %6 = arith.divf %4, %5 : vector<16x1xf32>
    %7 = vector.broadcast %6 : vector<16x1xf32> to vector<16x32xf32>
    %8 = arith.subf %0, %7 : vector<16x32xf32>
    %9 = arith.mulf %8, %8 : vector<16x32xf32>
    %cst_6 = arith.constant dense<0.000000e+00> : vector<16xf32>
    %10 = vector.multi_reduction <add>, %9, %cst_6 [1] : vector<16x32xf32> to vector<16xf32>
    %11 = vector.shape_cast %10 : vector<16xf32> to vector<16x1xf32>
    %cst_7 = arith.constant 3.200000e+01 : f32
    %12 = vector.broadcast %cst_7 : f32 to vector<16x1xf32>
    %13 = arith.divf %11, %12 : vector<16x1xf32>
    %14 = vector.broadcast %6 : vector<16x1xf32> to vector<16x32xf32>
    %15 = arith.subf %0, %14 : vector<16x32xf32>
    %cst_8 = arith.constant 9.99999974E-6 : f32
    %16 = vector.broadcast %cst_8 : f32 to vector<16x1xf32>
    %17 = arith.addf %13, %16 : vector<16x1xf32>
    %18 = math.rsqrt %17 : vector<16x1xf32>
    %19 = vector.broadcast %18 : vector<16x1xf32> to vector<16x32xf32>
    %20 = arith.mulf %15, %19 : vector<16x32xf32>
    %21 = vector.broadcast %1 : vector<1x32xf32> to vector<16x32xf32>
    %22 = arith.mulf %20, %21 : vector<16x32xf32>
    %23 = vector.broadcast %2 : vector<1x32xf32> to vector<16x32xf32>
    %24 = arith.addf %22, %23 : vector<16x32xf32>
    %25 = arith.truncf %24 : vector<16x32xf32> to vector<16x32xbf16>
    %c0_9 = arith.constant 0 : index
    %c0_10 = arith.constant 0 : index
    %26 = vector.load %arg4[%c0_9, %c0_10] : memref<32x96xbf16, #tpu.memory_space<vmem>>, vector<32x96xbf16>
    %cst_11 = arith.constant dense<0.000000e+00> : vector<16x96xf32>
    %27 = tpu.matmul %25, %26, %cst_11 {dimension_numbers = #tpu.dot_dimension_numbers<[1], [0], [0], [1], [0, 0, 1, 1], [], []>} : vector<16x32xbf16>, vector<32x96xbf16>, vector<16x96xf32> -> vector<16x96xf32>
    %c0_12 = arith.constant 0 : index
    %c0_13 = arith.constant 0 : index
    %28 = vector.load %arg5[%c0_12, %c0_13] : memref<1x96xf32, #tpu.memory_space<vmem>>, vector<1x96xf32>
    %29 = vector.broadcast %28 : vector<1x96xf32> to vector<16x96xf32>
    %30 = arith.addf %27, %29 : vector<16x96xf32>
    %31 = tpu.iota {dimensions = array<i32: 0>} : vector<8x8xi32>
    %32 = tpu.iota {dimensions = array<i32: 1>} : vector<8x8xi32>
    %33 = arith.cmpi sge, %31, %32 : vector<8x8xi32>
    %c0_14 = arith.constant 0 : index
    %c0_15 = arith.constant 0 : index
    %34 = vector.load %arg1[%c0_14, %c0_15] : memref<2x8xf32, #tpu.memory_space<vmem>>, vector<2x8xf32>
    %cst_16 = arith.constant 5.000000e-01 : f32
    %35 = vector.broadcast %cst_16 : f32 to vector<2x8xf32>
    %36 = arith.cmpf ogt, %34, %35 : vector<2x8xf32>
    %37 = vector.shape_cast %33 : vector<8x8xi1> to vector<1x8x8xi1>
    %38 = vector.shape_cast %36 : vector<2x8xi1> to vector<2x1x8xi1>
    %39 = vector.broadcast %37 : vector<1x8x8xi1> to vector<2x8x8xi1>
    %40 = vector.broadcast %38 : vector<2x1x8xi1> to vector<2x8x8xi1>
    %41 = arith.andi %39, %40 : vector<2x8x8xi1>
    %cst_17 = arith.constant 0.000000e+00 : f32
    %cst_18 = arith.constant -1.000000e+09 : f32
    %42 = vector.broadcast %cst_17 : f32 to vector<2x8x8xf32>
    %43 = vector.broadcast %cst_18 : f32 to vector<2x8x8xf32>
    %44 = arith.select %41, %42, %43 : vector<2x8x8xi1>, vector<2x8x8xf32>
    %cst_19 = arith.constant 0.000000e+00 : f32
    %45 = vector.broadcast %cst_19 : f32 to vector<16x32xf32>
    %46 = vector.extract_strided_slice %30 {offsets = [0, 0], sizes = [16, 8], strides = [1, 1]} : vector<16x96xf32> to vector<16x8xf32>
    %47 = vector.shape_cast %46 : vector<16x8xf32> to vector<2x8x8xf32>
    %48 = vector.extract_strided_slice %30 {offsets = [0, 32], sizes = [16, 8], strides = [1, 1]} : vector<16x96xf32> to vector<16x8xf32>
    %49 = vector.shape_cast %48 : vector<16x8xf32> to vector<2x8x8xf32>
    %50 = vector.extract_strided_slice %30 {offsets = [0, 64], sizes = [16, 8], strides = [1, 1]} : vector<16x96xf32> to vector<16x8xf32>
    %51 = vector.shape_cast %50 : vector<16x8xf32> to vector<2x8x8xf32>
    %52 = arith.truncf %47 : vector<2x8x8xf32> to vector<2x8x8xbf16>
    %53 = arith.truncf %49 : vector<2x8x8xf32> to vector<2x8x8xbf16>
    "tpu.trace_start"() <{level = 10 : i32, message = "bqd,bkd->bqk"}> : () -> ()
    %cst_20 = arith.constant dense<0.000000e+00> : vector<2x8x8xf32>
    %54 = tpu.matmul %52, %53, %cst_20 {dimension_numbers = #tpu.dot_dimension_numbers<[2], [2], [1], [1], [0, 0, 0, 1, 1, 1], [0], [0]>} : vector<2x8x8xbf16>, vector<2x8x8xbf16>, vector<2x8x8xf32> -> vector<2x8x8xf32>
    "tpu.trace_stop"() : () -> ()
    %cst_21 = arith.constant 0.353553385 : f32
    %55 = vector.broadcast %cst_21 : f32 to vector<2x8x8xf32>
    %56 = arith.mulf %54, %55 : vector<2x8x8xf32>
    %57 = arith.addf %56, %44 : vector<2x8x8xf32>
    %cst_22 = arith.constant dense<0xFF800000> : vector<2x8xf32>
    %58 = vector.multi_reduction <maximumf>, %57, %cst_22 [2] : vector<2x8x8xf32> to vector<2x8xf32>
    %59 = vector.shape_cast %58 : vector<2x8xf32> to vector<2x8x1xf32>
    %60 = vector.broadcast %59 : vector<2x8x1xf32> to vector<2x8x8xf32>
    %61 = arith.subf %57, %60 : vector<2x8x8xf32>
    %62 = math.exp %61 : vector<2x8x8xf32>
    %cst_23 = arith.constant dense<0.000000e+00> : vector<2x8xf32>
    %63 = vector.multi_reduction <add>, %62, %cst_23 [2] : vector<2x8x8xf32> to vector<2x8xf32>
    %64 = vector.shape_cast %63 : vector<2x8xf32> to vector<2x8x1xf32>
    %65 = tpu.reciprocal %64 {approx = true} : vector<2x8x1xf32> -> vector<2x8x1xf32>
    %66 = vector.broadcast %65 : vector<2x8x1xf32> to vector<2x8x8xf32>
    %67 = arith.mulf %62, %66 : vector<2x8x8xf32>
    %68 = arith.truncf %67 : vector<2x8x8xf32> to vector<2x8x8xbf16>
    %69 = arith.truncf %51 : vector<2x8x8xf32> to vector<2x8x8xbf16>
    "tpu.trace_start"() <{level = 10 : i32, message = "bqk,bkd->bqd"}> : () -> ()
    %cst_24 = arith.constant dense<0.000000e+00> : vector<2x8x8xf32>
    %70 = tpu.matmul %68, %69, %cst_24 {dimension_numbers = #tpu.dot_dimension_numbers<[2], [1], [1], [2], [0, 0, 0, 1, 1, 2], [0], [0]>} : vector<2x8x8xbf16>, vector<2x8x8xbf16>, vector<2x8x8xf32> -> vector<2x8x8xf32>
    "tpu.trace_stop"() : () -> ()
    %71 = vector.shape_cast %70 : vector<2x8x8xf32> to vector<16x8xf32>
    %72 = arith.truncf %71 : vector<16x8xf32> to vector<16x8xbf16>
    %c0_25 = arith.constant 0 : index
    %c0_26 = arith.constant 0 : index
    %73 = vector.load %arg6[%c0_25, %c0_26] : memref<32x32xbf16, #tpu.memory_space<vmem>>, vector<8x32xbf16>
    %cst_27 = arith.constant dense<0.000000e+00> : vector<16x32xf32>
    %74 = tpu.matmul %72, %73, %cst_27 {dimension_numbers = #tpu.dot_dimension_numbers<[1], [0], [0], [1], [0, 0, 1, 1], [], []>} : vector<16x8xbf16>, vector<8x32xbf16>, vector<16x32xf32> -> vector<16x32xf32>
    %75 = arith.addf %45, %74 : vector<16x32xf32>
    %76 = vector.extract_strided_slice %30 {offsets = [0, 8], sizes = [16, 8], strides = [1, 1]} : vector<16x96xf32> to vector<16x8xf32>
    %77 = vector.shape_cast %76 : vector<16x8xf32> to vector<2x8x8xf32>
    %78 = vector.extract_strided_slice %30 {offsets = [0, 40], sizes = [16, 8], strides = [1, 1]} : vector<16x96xf32> to vector<16x8xf32>
    %79 = vector.shape_cast %78 : vector<16x8xf32> to vector<2x8x8xf32>
    %80 = vector.extract_strided_slice %30 {offsets = [0, 72], sizes = [16, 8], strides = [1, 1]} : vector<16x96xf32> to vector<16x8xf32>
    %81 = vector.shape_cast %80 : vector<16x8xf32> to vector<2x8x8xf32>
    %82 = arith.truncf %77 : vector<2x8x8xf32> to vector<2x8x8xbf16>
    %83 = arith.truncf %79 : vector<2x8x8xf32> to vector<2x8x8xbf16>
    "tpu.trace_start"() <{level = 10 : i32, message = "bqd,bkd->bqk"}> : () -> ()
    %cst_28 = arith.constant dense<0.000000e+00> : vector<2x8x8xf32>
    %84 = tpu.matmul %82, %83, %cst_28 {dimension_numbers = #tpu.dot_dimension_numbers<[2], [2], [1], [1], [0, 0, 0, 1, 1, 1], [0], [0]>} : vector<2x8x8xbf16>, vector<2x8x8xbf16>, vector<2x8x8xf32> -> vector<2x8x8xf32>
    "tpu.trace_stop"() : () -> ()
    %cst_29 = arith.constant 0.353553385 : f32
    %85 = vector.broadcast %cst_29 : f32 to vector<2x8x8xf32>
    %86 = arith.mulf %84, %85 : vector<2x8x8xf32>
    %87 = arith.addf %86, %44 : vector<2x8x8xf32>
    %cst_30 = arith.constant dense<0xFF800000> : vector<2x8xf32>
    %88 = vector.multi_reduction <maximumf>, %87, %cst_30 [2] : vector<2x8x8xf32> to vector<2x8xf32>
    %89 = vector.shape_cast %88 : vector<2x8xf32> to vector<2x8x1xf32>
    %90 = vector.broadcast %89 : vector<2x8x1xf32> to vector<2x8x8xf32>
    %91 = arith.subf %87, %90 : vector<2x8x8xf32>
    %92 = math.exp %91 : vector<2x8x8xf32>
    %cst_31 = arith.constant dense<0.000000e+00> : vector<2x8xf32>
    %93 = vector.multi_reduction <add>, %92, %cst_31 [2] : vector<2x8x8xf32> to vector<2x8xf32>
    %94 = vector.shape_cast %93 : vector<2x8xf32> to vector<2x8x1xf32>
    %95 = tpu.reciprocal %94 {approx = true} : vector<2x8x1xf32> -> vector<2x8x1xf32>
    %96 = vector.broadcast %95 : vector<2x8x1xf32> to vector<2x8x8xf32>
    %97 = arith.mulf %92, %96 : vector<2x8x8xf32>
    %98 = arith.truncf %97 : vector<2x8x8xf32> to vector<2x8x8xbf16>
    %99 = arith.truncf %81 : vector<2x8x8xf32> to vector<2x8x8xbf16>
    "tpu.trace_start"() <{level = 10 : i32, message = "bqk,bkd->bqd"}> : () -> ()
    %cst_32 = arith.constant dense<0.000000e+00> : vector<2x8x8xf32>
    %100 = tpu.matmul %98, %99, %cst_32 {dimension_numbers = #tpu.dot_dimension_numbers<[2], [1], [1], [2], [0, 0, 0, 1, 1, 2], [0], [0]>} : vector<2x8x8xbf16>, vector<2x8x8xbf16>, vector<2x8x8xf32> -> vector<2x8x8xf32>
    "tpu.trace_stop"() : () -> ()
    %101 = vector.shape_cast %100 : vector<2x8x8xf32> to vector<16x8xf32>
    %102 = arith.truncf %101 : vector<16x8xf32> to vector<16x8xbf16>
    %c8 = arith.constant 8 : index
    %c0_33 = arith.constant 0 : index
    %103 = vector.load %arg6[%c8, %c0_33] : memref<32x32xbf16, #tpu.memory_space<vmem>>, vector<8x32xbf16>
    %cst_34 = arith.constant dense<0.000000e+00> : vector<16x32xf32>
    %104 = tpu.matmul %102, %103, %cst_34 {dimension_numbers = #tpu.dot_dimension_numbers<[1], [0], [0], [1], [0, 0, 1, 1], [], []>} : vector<16x8xbf16>, vector<8x32xbf16>, vector<16x32xf32> -> vector<16x32xf32>
    %105 = arith.addf %75, %104 : vector<16x32xf32>
    %106 = vector.extract_strided_slice %30 {offsets = [0, 16], sizes = [16, 8], strides = [1, 1]} : vector<16x96xf32> to vector<16x8xf32>
    %107 = vector.shape_cast %106 : vector<16x8xf32> to vector<2x8x8xf32>
    %108 = vector.extract_strided_slice %30 {offsets = [0, 48], sizes = [16, 8], strides = [1, 1]} : vector<16x96xf32> to vector<16x8xf32>
    %109 = vector.shape_cast %108 : vector<16x8xf32> to vector<2x8x8xf32>
    %110 = vector.extract_strided_slice %30 {offsets = [0, 80], sizes = [16, 8], strides = [1, 1]} : vector<16x96xf32> to vector<16x8xf32>
    %111 = vector.shape_cast %110 : vector<16x8xf32> to vector<2x8x8xf32>
    %112 = arith.truncf %107 : vector<2x8x8xf32> to vector<2x8x8xbf16>
    %113 = arith.truncf %109 : vector<2x8x8xf32> to vector<2x8x8xbf16>
    "tpu.trace_start"() <{level = 10 : i32, message = "bqd,bkd->bqk"}> : () -> ()
    %cst_35 = arith.constant dense<0.000000e+00> : vector<2x8x8xf32>
    %114 = tpu.matmul %112, %113, %cst_35 {dimension_numbers = #tpu.dot_dimension_numbers<[2], [2], [1], [1], [0, 0, 0, 1, 1, 1], [0], [0]>} : vector<2x8x8xbf16>, vector<2x8x8xbf16>, vector<2x8x8xf32> -> vector<2x8x8xf32>
    "tpu.trace_stop"() : () -> ()
    %cst_36 = arith.constant 0.353553385 : f32
    %115 = vector.broadcast %cst_36 : f32 to vector<2x8x8xf32>
    %116 = arith.mulf %114, %115 : vector<2x8x8xf32>
    %117 = arith.addf %116, %44 : vector<2x8x8xf32>
    %cst_37 = arith.constant dense<0xFF800000> : vector<2x8xf32>
    %118 = vector.multi_reduction <maximumf>, %117, %cst_37 [2] : vector<2x8x8xf32> to vector<2x8xf32>
    %119 = vector.shape_cast %118 : vector<2x8xf32> to vector<2x8x1xf32>
    %120 = vector.broadcast %119 : vector<2x8x1xf32> to vector<2x8x8xf32>
    %121 = arith.subf %117, %120 : vector<2x8x8xf32>
    %122 = math.exp %121 : vector<2x8x8xf32>
    %cst_38 = arith.constant dense<0.000000e+00> : vector<2x8xf32>
    %123 = vector.multi_reduction <add>, %122, %cst_38 [2] : vector<2x8x8xf32> to vector<2x8xf32>
    %124 = vector.shape_cast %123 : vector<2x8xf32> to vector<2x8x1xf32>
    %125 = tpu.reciprocal %124 {approx = true} : vector<2x8x1xf32> -> vector<2x8x1xf32>
    %126 = vector.broadcast %125 : vector<2x8x1xf32> to vector<2x8x8xf32>
    %127 = arith.mulf %122, %126 : vector<2x8x8xf32>
    %128 = arith.truncf %127 : vector<2x8x8xf32> to vector<2x8x8xbf16>
    %129 = arith.truncf %111 : vector<2x8x8xf32> to vector<2x8x8xbf16>
    "tpu.trace_start"() <{level = 10 : i32, message = "bqk,bkd->bqd"}> : () -> ()
    %cst_39 = arith.constant dense<0.000000e+00> : vector<2x8x8xf32>
    %130 = tpu.matmul %128, %129, %cst_39 {dimension_numbers = #tpu.dot_dimension_numbers<[2], [1], [1], [2], [0, 0, 0, 1, 1, 2], [0], [0]>} : vector<2x8x8xbf16>, vector<2x8x8xbf16>, vector<2x8x8xf32> -> vector<2x8x8xf32>
    "tpu.trace_stop"() : () -> ()
    %131 = vector.shape_cast %130 : vector<2x8x8xf32> to vector<16x8xf32>
    %132 = arith.truncf %131 : vector<16x8xf32> to vector<16x8xbf16>
    %c16 = arith.constant 16 : index
    %c0_40 = arith.constant 0 : index
    %133 = vector.load %arg6[%c16, %c0_40] : memref<32x32xbf16, #tpu.memory_space<vmem>>, vector<8x32xbf16>
    %cst_41 = arith.constant dense<0.000000e+00> : vector<16x32xf32>
    %134 = tpu.matmul %132, %133, %cst_41 {dimension_numbers = #tpu.dot_dimension_numbers<[1], [0], [0], [1], [0, 0, 1, 1], [], []>} : vector<16x8xbf16>, vector<8x32xbf16>, vector<16x32xf32> -> vector<16x32xf32>
    %135 = arith.addf %105, %134 : vector<16x32xf32>
    %136 = vector.extract_strided_slice %30 {offsets = [0, 24], sizes = [16, 8], strides = [1, 1]} : vector<16x96xf32> to vector<16x8xf32>
    %137 = vector.shape_cast %136 : vector<16x8xf32> to vector<2x8x8xf32>
    %138 = vector.extract_strided_slice %30 {offsets = [0, 56], sizes = [16, 8], strides = [1, 1]} : vector<16x96xf32> to vector<16x8xf32>
    %139 = vector.shape_cast %138 : vector<16x8xf32> to vector<2x8x8xf32>
    %140 = vector.extract_strided_slice %30 {offsets = [0, 88], sizes = [16, 8], strides = [1, 1]} : vector<16x96xf32> to vector<16x8xf32>
    %141 = vector.shape_cast %140 : vector<16x8xf32> to vector<2x8x8xf32>
    %142 = arith.truncf %137 : vector<2x8x8xf32> to vector<2x8x8xbf16>
    %143 = arith.truncf %139 : vector<2x8x8xf32> to vector<2x8x8xbf16>
    "tpu.trace_start"() <{level = 10 : i32, message = "bqd,bkd->bqk"}> : () -> ()
    %cst_42 = arith.constant dense<0.000000e+00> : vector<2x8x8xf32>
    %144 = tpu.matmul %142, %143, %cst_42 {dimension_numbers = #tpu.dot_dimension_numbers<[2], [2], [1], [1], [0, 0, 0, 1, 1, 1], [0], [0]>} : vector<2x8x8xbf16>, vector<2x8x8xbf16>, vector<2x8x8xf32> -> vector<2x8x8xf32>
    "tpu.trace_stop"() : () -> ()
    %cst_43 = arith.constant 0.353553385 : f32
    %145 = vector.broadcast %cst_43 : f32 to vector<2x8x8xf32>
    %146 = arith.mulf %144, %145 : vector<2x8x8xf32>
    %147 = arith.addf %146, %44 : vector<2x8x8xf32>
    %cst_44 = arith.constant dense<0xFF800000> : vector<2x8xf32>
    %148 = vector.multi_reduction <maximumf>, %147, %cst_44 [2] : vector<2x8x8xf32> to vector<2x8xf32>
    %149 = vector.shape_cast %148 : vector<2x8xf32> to vector<2x8x1xf32>
    %150 = vector.broadcast %149 : vector<2x8x1xf32> to vector<2x8x8xf32>
    %151 = arith.subf %147, %150 : vector<2x8x8xf32>
    %152 = math.exp %151 : vector<2x8x8xf32>
    %cst_45 = arith.constant dense<0.000000e+00> : vector<2x8xf32>
    %153 = vector.multi_reduction <add>, %152, %cst_45 [2] : vector<2x8x8xf32> to vector<2x8xf32>
    %154 = vector.shape_cast %153 : vector<2x8xf32> to vector<2x8x1xf32>
    %155 = tpu.reciprocal %154 {approx = true} : vector<2x8x1xf32> -> vector<2x8x1xf32>
    %156 = vector.broadcast %155 : vector<2x8x1xf32> to vector<2x8x8xf32>
    %157 = arith.mulf %152, %156 : vector<2x8x8xf32>
    %158 = arith.truncf %157 : vector<2x8x8xf32> to vector<2x8x8xbf16>
    %159 = arith.truncf %141 : vector<2x8x8xf32> to vector<2x8x8xbf16>
    "tpu.trace_start"() <{level = 10 : i32, message = "bqk,bkd->bqd"}> : () -> ()
    %cst_46 = arith.constant dense<0.000000e+00> : vector<2x8x8xf32>
    %160 = tpu.matmul %158, %159, %cst_46 {dimension_numbers = #tpu.dot_dimension_numbers<[2], [1], [1], [2], [0, 0, 0, 1, 1, 2], [0], [0]>} : vector<2x8x8xbf16>, vector<2x8x8xbf16>, vector<2x8x8xf32> -> vector<2x8x8xf32>
    "tpu.trace_stop"() : () -> ()
    %161 = vector.shape_cast %160 : vector<2x8x8xf32> to vector<16x8xf32>
    %162 = arith.truncf %161 : vector<16x8xf32> to vector<16x8xbf16>
    %c24 = arith.constant 24 : index
    %c0_47 = arith.constant 0 : index
    %163 = vector.load %arg6[%c24, %c0_47] : memref<32x32xbf16, #tpu.memory_space<vmem>>, vector<8x32xbf16>
    %cst_48 = arith.constant dense<0.000000e+00> : vector<16x32xf32>
    %164 = tpu.matmul %162, %163, %cst_48 {dimension_numbers = #tpu.dot_dimension_numbers<[1], [0], [0], [1], [0, 0, 1, 1], [], []>} : vector<16x8xbf16>, vector<8x32xbf16>, vector<16x32xf32> -> vector<16x32xf32>
    %165 = arith.addf %135, %164 : vector<16x32xf32>
    %166 = arith.addf %0, %165 : vector<16x32xf32>
    %c0_49 = arith.constant 0 : index
    %c0_50 = arith.constant 0 : index
    %167 = vector.load %arg7[%c0_49, %c0_50] : memref<1x32xf32, #tpu.memory_space<vmem>>, vector<1x32xf32>
    %168 = vector.broadcast %167 : vector<1x32xf32> to vector<16x32xf32>
    %169 = arith.addf %166, %168 : vector<16x32xf32>
    %c0_51 = arith.constant 0 : index
    %c0_52 = arith.constant 0 : index
    %170 = vector.load %arg8[%c0_51, %c0_52] : memref<16x32xf32, #tpu.memory_space<vmem>>, vector<16x32xf32>
    tpu.vector_store %arg8[%c0_51, %c0_52], %169 {strides = array<i32>} : memref<16x32xf32, #tpu.memory_space<vmem>>, vector<16x32xf32>,
    return
  }
}

</mosaic_0001>

<bundles_post_ra>
// kernel: transformer_forward.9
= control target key start
LH: loop header
LB: loop body
LE: loop exit
PB: predicated region body
PF: predicated region fallthrough
CT: control target
= control target key end

     0   :  { %v170_v1 = vmov 0.0   ;;  %vm171_vm0 = vmmov 0   ;;  %vm20_vm1 = vcmask 523264   ;;  %s219_s0 = inlined_call_operand.vmem [shape: f32[16,32], index: 0, kind: input, shape index: {}]   ;;  %s220_s1 = inlined_call_operand.vmem [shape: bf16[32,64], index: 1, kind: input, shape index: {}]   ;;  %s221_s2 = inlined_call_operand.vmem [shape: f32[1,64], index: 2, kind: input, shape index: {}]   ;;  %s222_s3 = inlined_call_operand.hbm [shape: f32[16,64], index: 3, kind: output, shape index: {}]  }
   0x1   :  { %v146_v0 = vld [vmem:[%s220_s1 + $0x8] sm:$0xff]   ;;  %133 = vmatprep.subr.bf16.mxu0 %v170_v1  ;;  %v147_v2 = vld [vmem:[%s220_s1] sm:$0xff]   ;;  %137 = vmatprep.mubr.msk.bf16.mxu0 %vm171_vm0, %v170_v1 }
   0x2   :  { %134 = vmatpush3.bf16.msra.mxu0 %v146_v0  ;;  %v25_v3 = vld [vmem:[%s219_s0] sm:$0xff]  ;;  %v26_v4 = vld [vmem:[%s219_s0 + $0x8] sm:$0xff] }
   0x3   :  { %8 = vsyncpa [#allocation4], 0  ;;  %135 = vmatprep.subr.bf16.mxu0 %v170_v1  ;;  %21 = vst.msk [vmem:[#allocation2] sm:$0xff] %vm20_vm1, %v170_v1  ;;  %v27_v5 = vpack.c.bf16 %v26_v4, %v25_v3  ;;  %vm44_vm2 = vcmask 261120   ;;  %v129_v14 = vld [vmem:[%s221_s2] ss:$0 sm:$0xff] }
   0x4   :  { %22 = vst.msk [vmem:[#allocation2 + $0x8] sm:$0xff] %vm20_vm1, %v170_v1  ;;  %s172_s20 = smov [#allocation3]  }
   0x5   :  { %s115_s21 = sshll.u32 %s172_s20, 4  ;;  %s116_s21 = int_to_ptr.vmem [resolvable:$true] %s115_s21 }
   0x6   :  { %136 = vmatpush3.bf16.msra.mxu0 %v147_v2  ;;  %s148_s22 = scalar_lea.vmem %s116_s21, 256  ;;  %p153_p1 = scmp.lt.s32.totalorder %s116_s21, %s116_s21 }
   0x7   :  { %p149_p0 = scmp.ne.s32.totalorder %s116_s21, %s148_s22  ;;  %p154_p2 = scmp.lt.s32.totalorder %s148_s22, %s148_s22 }
   0x9   :  { %138 = vmatmul.mubr.msk.bf16.vlgmr.msra.gmra.mxu0 %vm44_vm2, %v27_v5  ;;  %p155_p3 = por %p154_p2, %p153_p1 }
   0xa   :  { %v23_v6 = vld [vmem:[#allocation2] sm:$0xff] }
   0xb   :  { %v24_v10 = vld [vmem:[#allocation2 + $0x8] sm:$0xff]  ;;  %p156_p4 = pnand %p155_p3, %p149_p0 }
  0xc9   :  { %v82_v7 = vpop.f32.mrf.mxu0 }
  0xca   :  { %v89_v8 = vadd.f32 %v82_v7, %v23_v6 }
  0xcb   :  { %v139_v9 = vpop.f32.mrf.mxu0 }
  0xcc   :  { %92 = vst.msk [vmem:[#allocation2] sm:$0xff] %vm20_vm1, %v89_v8 }
  0xcd   :  { %v85_v11 = vpop.f32.mrf.mxu0 }
  0xce   :  { %v90_v12 = vadd.f32 %v85_v11, %v24_v10 }
  0xcf   :  { %v140_v13 = vpop.f32.mrf.mxu0 }
  0xd0   :  { %93 = vst.msk [vmem:[#allocation2 + $0x8] sm:$0xff] %vm20_vm1, %v90_v12 }
  0xd3   :  { %v97_v15 = vld [vmem:[#allocation2] sm:$0xff] }
  0xd4   :  { %v106_v16 = vadd.f32 %v129_v14, %v97_v15 }
  0xd6   :  { %108 = vst.msk [vmem:[#allocation3] sm:$0xff] %vm20_vm1, %v106_v16 }
  0xd7   :  { %v98_v17 = vld [vmem:[#allocation2 + $0x8] sm:$0xff] }
  0xd8   :  { %v107_v18 = vadd.f32 %v129_v14, %v98_v17 }
  0xda   :  { %109 = vst.msk [vmem:[#allocation3 + $0x8] sm:$0xff] %vm20_vm1, %v107_v18 }
  0xdb   :  { %159 = shalt.err (!%p156_p4)
}
  0xdc   :  { %s173_s23 = smov 128   ;;  %s174_s2 = smov 8  }
  0xdd   :  { %121 = dma.vmem_to_hbm [thread:$0]  %s116_s21, 256, %s222_s3, [#allocation4], %s173_s23, %s173_s23, %s174_s2  }
  0xde   :  { %168 = dma.done.wait [#allocation4], 256  }
  0xdf   :  { %169 = vsyncadd [#allocation4], 4294967040 }
  0xe0   :  { %125 = vsyncpa [#allocation4], 1 }

// kernel: transformer_forward.6
= control target key start
LH: loop header
LB: loop body
LE: loop exit
PB: predicated region body
PF: predicated region fallthrough
CT: control target
= control target key end

     0   :  { %vm31_vm0 = vcmask 261120   ;;  %v357_v14 = vmov 0.0   ;;  %vm358_vm1 = vmmov 0   ;;  %s470_s0 = inlined_call_operand.vmem [shape: f32[16,32], index: 0, kind: input, shape index: {}]   ;;  %s471_s3 = inlined_call_operand.vmem [shape: bf16[32,128], index: 3, kind: input, shape index: {}]   ;;  %s472_s1 = inlined_call_operand.vmem [shape: f32[1,32], index: 1, kind: input, shape index: {}]   ;;  %s473_s2 = inlined_call_operand.vmem [shape: f32[1,32], index: 2, kind: input, shape index: {}]   ;;  %s474_s5 = inlined_call_operand.vmem [shape: bf16[128,32], index: 5, kind: input, shape index: {}]   ;;  %s475_s4 = inlined_call_operand.vmem [shape: f32[1,128], index: 4, kind: input, shape index: {}]   ;;  %s476_s6 = inlined_call_operand.vmem [shape: f32[1,32], index: 6, kind: input, shape index: {}]   ;;  %s477_s7 = inlined_call_operand.vmem [shape: f32[16,32], index: 7, kind: output, shape index: {}]  }
   0x1   :  { %v402_v0 = vld [vmem:[%s470_s0] sm:$0xff]  ;;  %v407_v1 = vld [vmem:[%s470_s0 + $0x8] sm:$0xff]  ;;  %309 = vmatprep.subr.bf16.mxu0 %v357_v14  ;;  %313 = vmatprep.mubr.msk.bf16.mxu0 %vm358_vm1, %v357_v14  ;;  %v341_v34 = vld [vmem:[%s474_s5 + $0x38] sm:$0xff]  }
   0x2   :  { %v32_v2 = vsel %vm31_vm0, %v402_v0, 0.0  ;;  %v35_v3 = vsel %vm31_vm0, %v407_v1, 0.0  ;;  %v339_v15 = vld [vmem:[%s471_s3 + $0x8] sm:$0xff]   ;;  %317 = vmatprep.subr.bf16.mxu1 %v357_v14  ;;  %333 = vmatprep.mubr.msk.bf16.mxu1 %vm358_vm1, %v357_v14  ;;  %v340_v16 = vld [vmem:[%s471_s3] sm:$0xff]   ;;  %v342_v35 = vld [vmem:[%s474_s5 + $0x30] sm:$0xff]  }
   0x3   :  { %33 = vadd.xlane.f32.xlu0 %v32_v2  ;;  %310 = vmatpush3.bf16.msra.mxu0 %v339_v15  ;;  %v282_v25 = vld [vmem:[%s472_s1] ss:$0 sm:$0xff]  ;;  %v343_v36 = vld [vmem:[%s474_s5 + $0x28] sm:$0xff]   ;;  %v345_v38 = vld [vmem:[%s474_s5 + $0x18] sm:$0xff]  }
   0x4   :  { %311 = vmatprep.subr.bf16.mxu0 %v357_v14  ;;  %v283_v29 = vld [vmem:[%s473_s2] ss:$0 sm:$0xff]  ;;  %318 = vmatpush3.bf16.msra.mxu1 %v341_v34  ;;  %v346_v39 = vld [vmem:[%s474_s5 + $0x10] sm:$0xff]   ;;  %v347_v40 = vld [vmem:[%s474_s5 + $0x8] sm:$0xff]  }
   0x5   :  { %319 = vmatprep.subr.bf16.mxu1 %v357_v14  ;;  %v344_v37 = vld [vmem:[%s474_s5 + $0x20] sm:$0xff]  }
   0x6   :  { %v348_v41 = vld [vmem:[%s474_s5] sm:$0xff]  }
   0x7   :  { %36 = vadd.xlane.f32.xlu0 %v35_v3  ;;  %312 = vmatpush3.bf16.msra.mxu0 %v340_v16  ;;  %v284_v42 = vld [vmem:[%s475_s4] ss:$0 sm:$0xff] }
   0x8   :  { %320 = vmatpush3.bf16.msra.mxu1 %v342_v35 }
   0x9   :  { %321 = vmatprep.subr.bf16.mxu1 %v357_v14 }
   0xc   :  { %322 = vmatpush3.bf16.msra.mxu1 %v343_v36 }
   0xd   :  { %323 = vmatprep.subr.bf16.mxu1 %v357_v14 }
  0x10   :  { %324 = vmatpush3.bf16.msra.mxu1 %v344_v37 }
  0x11   :  { %325 = vmatprep.subr.bf16.mxu1 %v357_v14 }
  0x14   :  { %326 = vmatpush3.bf16.msra.mxu1 %v345_v38 }
  0x15   :  { %327 = vmatprep.subr.bf16.mxu1 %v357_v14 }
  0x18   :  { %328 = vmatpush3.bf16.msra.mxu1 %v346_v39 }
  0x19   :  { %329 = vmatprep.subr.bf16.mxu1 %v357_v14 }
  0x1c   :  { %330 = vmatpush3.bf16.msra.mxu1 %v347_v40 }
  0x1d   :  { %331 = vmatprep.subr.bf16.mxu1 %v357_v14 }
  0x20   :  { %332 = vmatpush3.bf16.msra.mxu1 %v348_v41 }
  0x8c   :  { %v34_v4 = vpop.xlane.xlu0 %33 }
  0x8d   :  { %v39_v5 = vmul.f32 0.03125, %v34_v4 }
  0x8f   :  { %v41_v6 = vsub.f32 %v402_v0, %v39_v5 }
  0x90   :  { %v37_v7 = vpop.xlane.xlu0 %36 }
  0x91   :  { %v40_v8 = vmul.f32 0.03125, %v37_v7  ;;  %v43_v9 = vmul.f32 %v41_v6, %v41_v6 }
  0x93   :  { %v42_v10 = vsub.f32 %v407_v1, %v40_v8  ;;  %v45_v11 = vsel %vm31_vm0, %v43_v9, 0.0 }
  0x94   :  { %46 = vadd.xlane.f32.xlu1 %v45_v11 }
  0x95   :  { %v44_v12 = vmul.f32 %v42_v10, %v42_v10 }
  0x97   :  { %v48_v13 = vsel %vm31_vm0, %v44_v12, 0.0 }
  0x98   :  { %49 = vadd.xlane.f32.xlu1 %v48_v13 }
 0x11d   :  { %v47_v17 = vpop.xlane.xlu1 %46 }
 0x11e   :  { %v51_v18 = vmul.f32 0.03125, %v47_v17 }
 0x120   :  { %v53_v19 = vadd.f32 1e-05, %v51_v18 }
 0x121   :  { %v50_v20 = vpop.xlane.xlu1 %49 }
 0x122   :  { %349 = vrsqrt.f32 %v53_v19  ;;  %v52_v21 = vmul.f32 0.03125, %v50_v20 }
 0x124   :  { %v54_v22 = vadd.f32 1e-05, %v52_v21 }
 0x126   :  { %351 = vrsqrt.f32 %v54_v22 }
 0x12f   :  { %v350_v23 = vpop.eup %349 }
 0x130   :  { %v57_v24 = vmul.f32 %v350_v23, %v41_v6  ;;  %v288_v6 = vld [vmem:[%s476_s6] ss:$0 sm:$0xff] }
 0x132   :  { %v65_v28 = vmul.f32 %v282_v25, %v57_v24 }
 0x133   :  { %v352_v26 = vpop.eup %351 }
 0x134   :  { %v58_v27 = vmul.f32 %v352_v26, %v42_v10  ;;  %v73_v31 = vadd.f32 %v283_v29, %v65_v28 }
 0x136   :  { %v66_v30 = vmul.f32 %v282_v25, %v58_v27 }
 0x138   :  { %v74_v32 = vadd.f32 %v283_v29, %v66_v30 }
 0x13a   :  { %v75_v33 = vpack.c.bf16 %v74_v32, %v73_v31 }
 0x13c   :  { %314 = vmatmul.mubr.msk.bf16.vlgmr.msra.gmra.mxu0 %vm31_vm0, %v75_v33 }
 0x1fc   :  { %v136_v43 = vpop.f32.mrf.mxu0 }
 0x1fd   :  { %v137_v44 = vadd.f32 %v284_v42, %v136_v43 }
 0x1fe   :  { %v315_v45 = vpop.f32.mrf.mxu0 }
 0x1ff   :  { %v143_v46 = vmul.f32 %v137_v44, %v137_v44 }
 0x200   :  { %v139_v47 = vpop.f32.mrf.mxu0 }
 0x201   :  { %v145_v48 = vmul.f32 %v143_v46, %v137_v44  ;;  %v140_v49 = vadd.f32 %v284_v42, %v139_v47 }
 0x202   :  { %v316_v50 = vpop.f32.mrf.mxu0 }
 0x203   :  { %v147_v51 = vmul.f32 0.044715, %v145_v48  ;;  %v144_v52 = vmul.f32 %v140_v49, %v140_v49 }
 0x205   :  { %v149_v53 = vadd.f32 %v147_v51, %v137_v44  ;;  %v146_v54 = vmul.f32 %v144_v52, %v140_v49 }
 0x207   :  { %v151_v55 = vmul.f32 0.7978846, %v149_v53  ;;  %v148_v56 = vmul.f32 0.044715, %v146_v54 }
 0x209   :  { %353 = vtanh.f32 %v151_v55  ;;  %v150_v57 = vadd.f32 %v148_v56, %v140_v49 }
 0x20b   :  { %v152_v58 = vmul.f32 0.7978846, %v150_v57 }
 0x20d   :  { %355 = vtanh.f32 %v152_v58 }
 0x216   :  { %v354_v59 = vpop.eup %353 }
 0x217   :  { %v155_v60 = vadd.f32 1.0, %v354_v59 }
 0x219   :  { %v157_v63 = vmul.f32 0.5, %v155_v60 }
 0x21a   :  { %v356_v61 = vpop.eup %355 }
 0x21b   :  { %v156_v62 = vadd.f32 1.0, %v356_v61  ;;  %v159_v3 = vmul.f32 %v157_v63, %v137_v44 }
 0x21d   :  { %v158_v2 = vmul.f32 0.5, %v156_v62 }
 0x21f   :  { %v160_v4 = vmul.f32 %v158_v2, %v140_v49 }
 0x221   :  { %v161_v5 = vpack.c.bf16 %v160_v4, %v159_v3 }
 0x223   :  { %334 = vmatmul.mubr.bf16.vlgmr.msra.gmra.mxu1 %v161_v5 }
 0x2e3   :  { %v267_v7 = vpop.f32.mrf.mxu1 }
 0x2e4   :  { %v268_v8 = vadd.f32 %v288_v6, %v267_v7 }
 0x2e5   :  { %v335_v9 = vpop.f32.mrf.mxu1 }
 0x2e6   :  { %v274_v10 = vadd.f32 %v268_v8, %v402_v0 }
 0x2e7   :  { %v270_v11 = vpop.f32.mrf.mxu1 }
 0x2e8   :  { %276 = vst.msk [vmem:[%s477_s7] sm:$0xff] %vm31_vm0, %v274_v10  ;;  %v271_v12 = vadd.f32 %v288_v6, %v270_v11 }
 0x2e9   :  { %v336_v13 = vpop.f32.mrf.mxu1 }
 0x2ea   :  { %v275_v14 = vadd.f32 %v271_v12, %v407_v1 }
 0x2ec   :  { %277 = vst.msk [vmem:[%s477_s7 + $0x8] sm:$0xff] %vm31_vm0, %v275_v14 }

// kernel: transformer_forward.5
= control target key start
LH: loop header
LB: loop body
LE: loop exit
PB: predicated region body
PF: predicated region fallthrough
CT: control target
= control target key end

     0   :  { %13 = vsyncpa [#allocation3], 0  ;;  %s2047_s0 = inlined_call_operand.vmem [shape: f32[16,32], index: 0, kind: input, shape index: {}]   ;;  %s2048_s1 = inlined_call_operand.vmem [shape: f32[2,8], index: 1, kind: input, shape index: {}]   ;;  %s2049_s2 = inlined_call_operand.hbm [shape: f32[1,32], index: 2, kind: input, shape index: {}]   ;;  %s2050_s3 = inlined_call_operand.hbm [shape: f32[1,32], index: 3, kind: input, shape index: {}]   ;;  %s2051_s4 = inlined_call_operand.vmem [shape: bf16[32,96], index: 4, kind: input, shape index: {}]   ;;  %s2052_s5 = inlined_call_operand.hbm [shape: f32[1,96], index: 5, kind: input, shape index: {}]   ;;  %s2053_s6 = inlined_call_operand.hbm [shape: bf16[32,32], index: 6, kind: input, shape index: {}]   ;;  %s2054_s7 = inlined_call_operand.hbm [shape: f32[1,32], index: 7, kind: input, shape index: {}]   ;;  %s2055_s8 = inlined_call_operand.vmem [shape: f32[16,32], index: 8, kind: output, shape index: {}]  }
   0x1   :  { %14 = vsyncpa [#allocation5], 0 }
   0x2   :  { %15 = vsyncpa [#allocation8], 0  ;;  %s1738_s27 = smov [#allocation4]   ;;  %s1739_s29 = smov [#allocation7]  }
   0x3   :  { %s36_s28 = sshll.u32 %s1738_s27, 4  ;;  %s57_s30 = sshll.u32 %s1739_s29, 4  ;;  %s37_s28 = int_to_ptr.vmem [resolvable:$true] %s36_s28  ;;  %s58_s30 = int_to_ptr.vmem [resolvable:$true] %s57_s30 }
   0x4   :  { %s1640_s9 = scalar_lea.vmem %s37_s28, 16  ;;  %s1644_s10 = scalar_lea.vmem %s37_s28, 32 }
   0x5   :  { %p1641_p0 = scmp.ne.s32.totalorder %s37_s28, %s1640_s9  ;;  %p1645_p1 = scmp.lt.s32.totalorder %s37_s28, %s37_s28 }
   0x6   :  { %p1646_p2 = scmp.lt.s32.totalorder %s1644_s10, %s1640_s9 }
   0x8   :  { %p1647_p3 = por %p1646_p2, %p1645_p1 }
   0xa   :  { %p1648_p4 = pnand %p1647_p3, %p1641_p0 }
   0xc   :  { %1651 = shalt.err (!%p1648_p4)
}
   0xd   :  { %39 = dma.hbm_to_vmem [thread:$0]  %s2050_s3, 16, %s37_s28, [#allocation5]  }
   0xe   :  { %s1660_s13 = scalar_lea.vmem %s58_s30, 256  ;;  %p1665_p6 = scmp.lt.s32.totalorder %s58_s30, %s58_s30 }
   0xf   :  { %p1661_p5 = scmp.ne.s32.totalorder %s58_s30, %s1660_s13  ;;  %p1666_p7 = scmp.lt.s32.totalorder %s1660_s13, %s1660_s13 }
  0x11   :  { %p1667_p8 = por %p1666_p7, %p1665_p6 }
  0x13   :  { %p1668_p9 = pnand %p1667_p8, %p1661_p5 }
  0x15   :  { %1671 = shalt.err (!%p1668_p9)
}
  0x16   :  { %s1740_s14 = smov 64   ;;  %s1741_s15 = smov 4  }
  0x17   :  { %63 = dma.hbm_to_vmem [thread:$0]  %s2053_s6, 256, %s58_s30, [#allocation8], %s1740_s14, %s1740_s14, %s1741_s15  }
  0x18   :  { %s1742_s18 = smov [#allocation2]   ;;  %s1743_s20 = smov [#allocation6]  }
  0x19   :  { %s26_s19 = sshll.u32 %s1742_s18, 4  ;;  %s48_s21 = sshll.u32 %s1743_s20, 4  ;;  %s27_s19 = int_to_ptr.vmem [resolvable:$true] %s26_s19  ;;  %s49_s21 = int_to_ptr.vmem [resolvable:$true] %s48_s21 }
  0x1a   :  { %s1680_s3 = scalar_lea.vmem %s27_s19, 16  ;;  %s1684_s22 = scalar_lea.vmem %s27_s19, 32 }
  0x1b   :  { %p1681_p10 = scmp.ne.s32.totalorder %s27_s19, %s1680_s3  ;;  %p1685_p11 = scmp.lt.s32.totalorder %s27_s19, %s27_s19 }
  0x1c   :  { %p1686_p12 = scmp.lt.s32.totalorder %s1684_s22, %s1680_s3 }
  0x1e   :  { %p1687_p13 = por %p1686_p12, %p1685_p11 }
  0x20   :  { %p1688_p0 = pnand %p1687_p13, %p1681_p10 }
  0x22   :  { %1691 = shalt.err (!%p1688_p0)
}
  0x23   :  { %29 = dma.hbm_to_vmem [thread:$0]  %s2049_s2, 16, %s27_s19, [#allocation3]  }
  0x24   :  { %s1700_s25 = scalar_lea.vmem %s49_s21, 16  ;;  %s1704_s6 = scalar_lea.vmem %s49_s21, 32 }
  0x25   :  { %p1701_p1 = scmp.ne.s32.totalorder %s49_s21, %s1700_s25  ;;  %p1705_p2 = scmp.lt.s32.totalorder %s49_s21, %s49_s21 }
  0x26   :  { %p1706_p3 = scmp.lt.s32.totalorder %s1704_s6, %s1700_s25 }
  0x28   :  { %p1707_p4 = por %p1706_p3, %p1705_p2 }
  0x2a   :  { %p1708_p5 = pnand %p1707_p4, %p1701_p1 }
  0x2c   :  { %1711 = shalt.err (!%p1708_p5)
}
  0x2d   :  { %51 = dma.hbm_to_vmem [thread:$0]  %s2052_s5, 16, %s49_s21, [#allocation5]  }
  0x2e   :  { %s1744_s28 = smov [#allocation9]  }
  0x2f   :  { %s70_s29 = sshll.u32 %s1744_s28, 4  ;;  %s71_s29 = int_to_ptr.vmem [resolvable:$true] %s70_s29 }
  0x30   :  { %s1720_s30 = scalar_lea.vmem %s71_s29, 16  ;;  %s1724_s9 = scalar_lea.vmem %s71_s29, 32 }
  0x31   :  { %p1721_p6 = scmp.ne.s32.totalorder %s71_s29, %s1720_s30  ;;  %p1725_p7 = scmp.lt.s32.totalorder %s71_s29, %s71_s29 }
  0x32   :  { %p1726_p8 = scmp.lt.s32.totalorder %s1724_s9, %s1720_s30 }
  0x34   :  { %p1727_p9 = por %p1726_p8, %p1725_p7 }
  0x36   :  { %p1728_p10 = pnand %p1727_p9, %p1721_p6 }
  0x38   :  { %1731 = shalt.err (!%p1728_p10)
}
  0x39   :  { %73 = dma.hbm_to_vmem [thread:$0]  %s2054_s7, 16, %s71_s29, [#allocation8]  }
  0x3a   :  { %1732 = dma.done.wait [#allocation3], 16  }
  0x3b   :  { %1733 = vsyncadd [#allocation3], 4294967280 }
  0x3c   :  { %1734 = dma.done.wait [#allocation5], 32  }
  0x3d   :  { %1735 = vsyncadd [#allocation5], 4294967264 }
  0x3e   :  { %1736 = dma.done.wait [#allocation8], 272  }
  0x3f   :  { %1737 = vsyncadd [#allocation8], 4294967024  ;;  %vm94_vm0 = vcmask 261120   ;;  %v1825_v0 = vld [vmem:[%s2047_s0] sm:$0xff]  ;;  %v1830_v1 = vld [vmem:[%s2047_s0 + $0x8] sm:$0xff]  ;;  %v1745_v15 = vmov 0.0   ;;  %v206_v47 = vlaneseq }
  0x40   :  { %v95_v2 = vsel %vm94_vm0, %v1825_v0, 0.0  ;;  %v98_v3 = vsel %vm94_vm0, %v1830_v1, 0.0  ;;  %v1594_v14 = vld [vmem:[%s2051_s4 + $0x8] sm:$0xff]   ;;  %1444 = vmatprep.subr.bf16.mxu0 %v1745_v15  ;;  %vm1746_vm1 = vmmov 0   ;;  %v1595_v16 = vld [vmem:[%s2051_s4] sm:$0xff]   ;;  %1452 = vmatprep.subr.bf16.mxu1 %v1745_v15  ;;  %s1747_s4 = smov 96  }
  0x41   :  { %96 = vadd.xlane.f32.xlu0 %v95_v2  ;;  %1448 = vmatprep.mubr.msk.bf16.mxu0 %vm1746_vm1, %v1745_v15  ;;  %v1374_v25 = vld [vmem:[#allocation2] ss:$0 sm:$0xff]  ;;  %v1375_v29 = vld [vmem:[#allocation4] ss:$0 sm:$0xff]  ;;  %v1376_v34 = vld [vmem:[#allocation6] ss:$0 sm:$0xff] }
  0x42   :  { %1445 = vmatpush3.bf16.msra.mxu0 %v1594_v14  ;;  %1454 = vmatprep.mubr.msk.bf16.mxu1 %vm1746_vm1, %v1745_v15  ;;  %vm261_vm2 = vcmask 64512   ;;  %v1748_v48 = vmov 1966171168   ;;  %v211_v50 = vld [vmem:[%s2048_s1] sm:$0x3]  ;;  %v207_v51 = vshrl.u32 %v206_v47, 7 }
  0x43   :  { %1446 = vmatprep.subr.bf16.mxu0 %v1745_v15  ;;  %v215_v49 = vunpack.c.l.s4 %v1748_v48  ;;  %vm212_vm3 = vcmp.gt.f32.partialorder %v211_v50, 0.5  ;;  %v1749_v54 = vmov 0   ;;  %v209_v62 = vand.u32 127, %v206_v47  ;;  %s1751_s1 = smov 88   ;;  %s1752_s19 = smov 120  }
  0x44   :  { %v213_v55 = vsel %vm212_vm3, 1, %v1749_v54  ;;  %v244_v60 = vsub.s32 0, %v207_v51  ;;  %vm390_vm11 = vcmask 1043456   ;;  %s1754_s20 = smov 80   ;;  %s1755_s21 = smov 112  }
  0x45   :  { %99 = vadd.xlane.f32.xlu0 %v98_v3  ;;  %v216_v52 = vunpack.c.0.s8 %v215_v49  ;;  %vm210_vm6 = vcmp.ge.s32.totalorder %v207_v51, %v209_v62  ;;  %s1756_s3 = smov 48   ;;  %s1757_s22 = smov 72  }
  0x46   :  { %1447 = vmatpush3.bf16.msra.mxu0 %v1595_v16  ;;  %s1758_s23 = smov 104   ;;  %s1759_s24 = smov 40  }
  0x47   :  { %1458 = vmatprep.subr.bf16.mxu0 %v1745_v15  ;;  %v219_v53 = vsub.s32 %v216_v52, %v207_v51 }
  0x49   :  { %v220_v56 = vrot.slane %v213_v55, %v219_v53 }
  0x4b   :  { %v228_v57 = vrot.slane %v220_v56, %v219_v53  ;;  %v221_v58 = vcombine.high %v220_v56, %v220_v56 }
  0x4d   :  { %vm236_vm4 = vcmp.ne.s32.totalorder %v228_v57, 0  ;;  %v235_v59 = vrot.slane %v221_v58, %v219_v53 }
  0x4e   :  { %v240_v61 = vsel %vm236_vm4, 1, %v1749_v54 }
  0x4f   :  { %vm237_vm5 = vcmp.ne.s32.totalorder %v235_v59, 0  ;;  %v245_v63 = vrot.slane %v240_v61, %v244_v60 }
  0x50   :  { %v241_v2 = vsel %vm237_vm5, 1, %v1749_v54 }
  0x51   :  { %vm250_vm7 = vcmp.eq.s32.totalorder %v245_v63, 1  ;;  %v249_v3 = vrot.slane %v241_v2, %v244_v60 }
  0x52   :  { %vm252_vm8 = vmand %vm210_vm6, %vm250_vm7 }
  0x53   :  { %vm251_vm9 = vcmp.eq.s32.totalorder %v249_v3, 1 }
  0x54   :  { %vm253_vm10 = vmand %vm210_vm6, %vm251_vm9 }
  0xca   :  { %v97_v4 = vpop.xlane.xlu0 %96 }
  0xcb   :  { %v102_v5 = vmul.f32 0.03125, %v97_v4 }
  0xcd   :  { %v104_v6 = vsub.f32 %v1825_v0, %v102_v5  ;;  %v1750_v5 = vmov -1e+09  }
  0xce   :  { %v100_v7 = vpop.xlane.xlu0 %99 }
  0xcf   :  { %v103_v8 = vmul.f32 0.03125, %v100_v7  ;;  %v106_v9 = vmul.f32 %v104_v6, %v104_v6 }
  0xd1   :  { %v105_v10 = vsub.f32 %v1830_v1, %v103_v8  ;;  %v108_v11 = vsel %vm94_vm0, %v106_v9, 0.0 }
  0xd2   :  { %109 = vadd.xlane.f32.xlu1 %v108_v11 }
  0xd3   :  { %v107_v12 = vmul.f32 %v105_v10, %v105_v10 }
  0xd5   :  { %v111_v13 = vsel %vm94_vm0, %v107_v12, 0.0  ;;  %v1881_v12 = vsel %vm253_vm10, 0.0, %v1750_v5 }
  0xd6   :  { %112 = vadd.xlane.f32.xlu1 %v111_v13 }
 0x15b   :  { %v110_v17 = vpop.xlane.xlu1 %109 }
 0x15c   :  { %v114_v18 = vmul.f32 0.03125, %v110_v17 }
 0x15e   :  { %v116_v19 = vadd.f32 1e-05, %v114_v18 }
 0x15f   :  { %v113_v20 = vpop.xlane.xlu1 %112 }
 0x160   :  { %1596 = vrsqrt.f32 %v116_v19  ;;  %v115_v21 = vmul.f32 0.03125, %v113_v20 }
 0x162   :  { %v117_v22 = vadd.f32 1e-05, %v115_v21 }
 0x164   :  { %1598 = vrsqrt.f32 %v117_v22 }
 0x16d   :  { %v1597_v23 = vpop.eup %1596 }
 0x16e   :  { %v120_v24 = vmul.f32 %v1597_v23, %v104_v6  ;;  %v1878_v6 = vsel %vm252_vm8, 0.0, %v1750_v5 }
 0x170   :  { %v128_v28 = vmul.f32 %v1374_v25, %v120_v24 }
 0x171   :  { %v1599_v26 = vpop.eup %1598 }
 0x172   :  { %v121_v27 = vmul.f32 %v1599_v26, %v105_v10  ;;  %v136_v31 = vadd.f32 %v1375_v29, %v128_v28 }
 0x174   :  { %v129_v30 = vmul.f32 %v1374_v25, %v121_v27 }
 0x176   :  { %v137_v32 = vadd.f32 %v1375_v29, %v129_v30 }
 0x178   :  { %v138_v33 = vpack.c.bf16 %v137_v32, %v136_v31 }
 0x17a   :  { %1449 = vmatmul.mubr.msk.bf16.vlgmr.msra.gmra.mxu0 %vm94_vm0, %v138_v33 }
 0x17b   :  { %1460 = vmatprep.mubr.msk.bf16.mxu0 %vm1746_vm1, %v1745_v15 }
 0x23a   :  { %v199_v35 = vpop.f32.mrf.mxu0 }
 0x23b   :  { %v200_v36 = vadd.f32 %v1376_v34, %v199_v35 }
 0x23c   :  { %v1450_v37 = vpop.f32.mrf.mxu0 }
 0x23d   :  { %v1857_v38 = vpack.c.bf16 %v200_v36, %v200_v36 }
 0x23e   :  { %v202_v39 = vpop.f32.mrf.mxu0 }
 0x23f   :  { %v203_v40 = vadd.f32 %v1376_v34, %v202_v39  ;;  %259 = vrot.lane.b32.xlu0 %v1857_v38, %s1747_s4 }
 0x240   :  { %v1451_v41 = vpop.f32.mrf.mxu0 }
 0x241   :  { %v1860_v42 = vpack.c.bf16 %v203_v40, %v203_v40 }
 0x243   :  { %309 = vrot.lane.b32.xlu1 %v1860_v42, %s1747_s4 }
 0x2b1   :  { %v260_v43 = vpop.permute.xlu0 %259 }
 0x2b2   :  { %v266_v44 = vsel %vm261_vm2, %v260_v43, 0 }
 0x2b3   :  { %1453 = vmatpush3.bf16.xpose.msra.mxu1 %v266_v44 }
 0x2b4   :  { %1464 = vmatprep.subr.bf16.mxu1 %v1745_v15 }
 0x2b5   :  { %v310_v45 = vpop.permute.xlu1 %309 }
 0x2b6   :  { %v315_v46 = vsel %vm261_vm2, %v310_v45, 0 }
 0x2b7   :  { %1459 = vmatpush3.bf16.xpose.msra.mxu0 %v315_v46 }
 0x2b8   :  { %1470 = vmatprep.subr.bf16.mxu0 %v1745_v15 }
 0x2ba   :  { %1455 = vmatmul.mubr.msk.bf16.vlgmr.msra.gmra.mxu1 %vm261_vm2, %v1857_v38 }
 0x2bb   :  { %1466 = vmatprep.mubr.msk.bf16.mxu1 %vm1746_vm1, %v1745_v15 }
 0x2be   :  { %1461 = vmatmul.mubr.msk.bf16.vlgmr.msra.gmra.mxu0 %vm261_vm2, %v1860_v42 }
 0x2bf   :  { %1472 = vmatprep.mubr.msk.bf16.mxu0 %vm1746_vm1, %v1745_v15 }
 0x37a   :  { %v302_v4 = vpop.f32.mrf.mxu1 }
 0x37b   :  { %v357_v7 = vmul.f32 0.35355338, %v302_v4 }
 0x37c   :  { %v1456_v8 = vpop.f32.mrf.mxu1 }
 0x37d   :  { %v359_v9 = vadd.f32 %v357_v7, %v1878_v6 }
 0x37e   :  { %v305_v10 = vpop.f32.mrf.mxu1  ;;  %v351_v11 = vpop.f32.mrf.mxu0 }
 0x37f   :  { %v358_v13 = vmul.f32 0.35355338, %v351_v11  ;;  %v361_v14 = vsel %vm261_vm2, %v359_v9, -inf }
 0x380   :  { %v1457_v16 = vpop.f32.mrf.mxu1  ;;  %362 = vmax.xlane.f32.xlu1 %v361_v14  ;;  %v1462_v17 = vpop.f32.mrf.mxu0 }
 0x381   :  { %v360_v18 = vadd.f32 %v358_v13, %v1881_v12 }
 0x382   :  { %v354_v19 = vpop.f32.mrf.mxu0 }
 0x383   :  { %v364_v20 = vsel %vm261_vm2, %v360_v18, -inf }
 0x384   :  { %365 = vmax.xlane.f32.xlu0 %v364_v20  ;;  %v1463_v21 = vpop.f32.mrf.mxu0 }
 0x391   :  { %434 = vrot.lane.b32.xlu1 %v1860_v42, %s1740_s14 }
 0x395   :  { %486 = vrot.lane.b32.xlu1 %v1857_v38, %s1751_s1 }
 0x409   :  { %v363_v22 = vpop.xlane.xlu1 %362 }
 0x40a   :  { %v367_v23 = vsub.f32 %v359_v9, %v363_v22 }
 0x40c   :  { %v369_v24 = vmul.f32 1.442695, %v367_v23 }
 0x40d   :  { %v435_v25 = vpop.permute.xlu1 %434  ;;  %v366_v26 = vpop.xlane.xlu0 %365 }
 0x40e   :  { %1600 = vpow2.f32 %v369_v24  ;;  %v440_v27 = vsel %vm390_vm11, %v435_v25, 0  ;;  %v368_v28 = vsub.f32 %v360_v18, %v366_v26 }
 0x40f   :  { %1471 = vmatpush3.bf16.msra.mxu0 %v440_v27 }
 0x410   :  { %v371_v29 = vmul.f32 1.442695, %v368_v28  ;;  %1482 = vmatprep.subr.bf16.mxu0 %v1745_v15 }
 0x411   :  { %v487_v34 = vpop.permute.xlu1 %486 }
 0x412   :  { %1602 = vpow2.f32 %v371_v29  ;;  %v492_v45 = vsel %vm261_vm2, %v487_v34, 0 }
 0x41b   :  { %v1601_v30 = vpop.eup %1600 }
 0x41c   :  { %v373_v31 = vsel %vm261_vm2, %v1601_v30, 0.0 }
 0x41d   :  { %374 = vadd.xlane.f32.xlu0 %v373_v31 }
 0x41f   :  { %v1603_v32 = vpop.eup %1602 }
 0x420   :  { %v376_v33 = vsel %vm261_vm2, %v1603_v32, 0.0 }
 0x421   :  { %377 = vadd.xlane.f32.xlu1 %v376_v33 }
 0x432   :  { %536 = vrot.lane.b32.xlu1 %v1860_v42, %s1751_s1 }
 0x433   :  { %385 = vrot.lane.b32.xlu0 %v1857_v38, %s1740_s14  ;;  %s1753_s14 = smov 56  }
 0x436   :  { %534 = vrot.lane.b32.xlu1 %v1860_v42, %s1752_s19 }
 0x437   :  { %484 = vrot.lane.b32.xlu0 %v1857_v38, %s1752_s19 }
 0x4a6   :  { %v375_v35 = vpop.xlane.xlu0 %374 }
 0x4a7   :  { %1604 = vrcp.f32 %v375_v35 }
 0x4aa   :  { %v378_v36 = vpop.xlane.xlu1 %377  ;;  %v386_v37 = vpop.permute.xlu0 %385 }
 0x4ab   :  { %1606 = vrcp.f32 %v378_v36  ;;  %v392_v39 = vsel %vm390_vm11, %v386_v37, 0  ;;  %v483_v36 = vld [vmem:[#allocation7] sm:$0xf] }
 0x4ac   :  { %1465 = vmatpush3.bf16.msra.mxu1 %v392_v39 }
 0x4ad   :  { %1476 = vmatprep.subr.bf16.mxu1 %v1745_v15 }
 0x4ae   :  { %v537_v47 = vpop.permute.xlu1 %536  ;;  %v485_v50 = vpop.permute.xlu0 %484 }
 0x4af   :  { %v542_v49 = vsel %vm261_vm2, %v537_v47, 0 }
 0x4b2   :  { %v535_v51 = vpop.permute.xlu1 %534 }
 0x4b4   :  { %v1605_v40 = vpop.eup %1604 }
 0x4b5   :  { %v381_v41 = vmul.f32 %v1605_v40, %v1601_v30  ;;  %v761_v40 = vsel %vm390_vm11, %v483_v36, 0 }
 0x4b7   :  { %v383_v43 = vpack.c.bf16 %v381_v41, %v381_v41 }
 0x4b8   :  { %v1607_v44 = vpop.eup %1606 }
 0x4b9   :  { %1467 = vmatmul.mubr.msk.bf16.vlgmr.msra.gmra.mxu1 %vm261_vm2, %v383_v43  ;;  %v382_v46 = vmul.f32 %v1607_v44, %v1603_v32 }
 0x4ba   :  { %1477 = vmatpush3.bf16.xpose.msra.mxu1 %v492_v45  ;;  %1478 = vmatprep.mubr.msk.bf16.mxu1 %vm1746_vm1, %v1745_v15 }
 0x4bb   :  { %v384_v48 = vpack.c.bf16 %v382_v46, %v382_v46  ;;  %1488 = vmatprep.subr.bf16.mxu1 %v1745_v15  ;;  %v709_v46 = vld [vmem:[#allocation7 + $0x4] sm:$0xf] }
 0x4bc   :  { %v714_v47 = vsel %vm390_vm11, %v709_v46, 0 }
 0x4bd   :  { %1473 = vmatmul.mubr.msk.bf16.vlgmr.msra.gmra.mxu0 %vm261_vm2, %v384_v48 }
 0x4be   :  { %1483 = vmatpush3.bf16.xpose.msra.mxu0 %v542_v49  ;;  %1484 = vmatprep.mubr.msk.bf16.mxu0 %vm1746_vm1, %v1745_v15 }
 0x4bf   :  { %1494 = vmatprep.subr.bf16.mxu0 %v1745_v15 }
 0x4c1   :  { %1479 = vmatmul.mubr.msk.bf16.vlgmr.msra.gmra.mxu1 %vm261_vm2, %v485_v50 }
 0x4c2   :  { %1490 = vmatprep.mubr.msk.bf16.mxu1 %vm1746_vm1, %v1745_v15 }
 0x4c5   :  { %1485 = vmatmul.mubr.msk.bf16.vlgmr.msra.gmra.mxu0 %vm261_vm2, %v535_v51 }
 0x4c6   :  { %1496 = vmatprep.mubr.msk.bf16.mxu0 %vm1746_vm1, %v1745_v15 }
 0x579   :  { %v1916_v52 = vpop.f32.mrf.mxu1 }
 0x57b   :  { %v1468_v53 = vpop.f32.mrf.mxu1 }
 0x57d   :  { %v431_v54 = vpop.f32.mrf.mxu1  ;;  %v1918_v55 = vpop.f32.mrf.mxu0 }
 0x57e   :  { %v482_v56 = vpack.c.bf16 %v1918_v55, %v1916_v52 }
 0x57f   :  { %v1469_v57 = vpop.f32.mrf.mxu1  ;;  %v1474_v58 = vpop.f32.mrf.mxu0 }
 0x581   :  { %v479_v59 = vpop.f32.mrf.mxu0  ;;  %v528_v60 = vpop.f32.mrf.mxu1 }
 0x582   :  { %v584_v61 = vmul.f32 0.35355338, %v528_v60 }
 0x583   :  { %v1475_v62 = vpop.f32.mrf.mxu0  ;;  %v1480_v63 = vpop.f32.mrf.mxu1 }
 0x584   :  { %v586_v2 = vadd.f32 %v584_v61, %v1878_v6 }
 0x585   :  { %v531_v3 = vpop.f32.mrf.mxu1  ;;  %v578_v4 = vpop.f32.mrf.mxu0 }
 0x586   :  { %v585_v5 = vmul.f32 0.35355338, %v578_v4  ;;  %v588_v7 = vsel %vm261_vm2, %v586_v2, -inf }
 0x587   :  { %589 = vmax.xlane.f32.xlu0 %v588_v7  ;;  %v1481_v8 = vpop.f32.mrf.mxu1  ;;  %v1486_v9 = vpop.f32.mrf.mxu0 }
 0x588   :  { %v587_v10 = vadd.f32 %v585_v5, %v1881_v12 }
 0x589   :  { %v581_v11 = vpop.f32.mrf.mxu0 }
 0x58a   :  { %v591_v13 = vsel %vm261_vm2, %v587_v10, -inf }
 0x58b   :  { %592 = vmax.xlane.f32.xlu1 %v591_v13  ;;  %v1487_v14 = vpop.f32.mrf.mxu0 }
 0x59c   :  { %660 = vrot.lane.b32.xlu1 %v1860_v42, %s1753_s14 }
 0x5a0   :  { %806 = vrot.lane.b32.xlu1 %v1857_v38, %s1754_s20 }
 0x5a4   :  { %856 = vrot.lane.b32.xlu1 %v1860_v42, %s1754_s20 }
 0x5a8   :  { %854 = vrot.lane.b32.xlu1 %v1860_v42, %s1755_s21 }
 0x610   :  { %v590_v16 = vpop.xlane.xlu0 %589 }
 0x611   :  { %v594_v17 = vsub.f32 %v586_v2, %v590_v16 }
 0x613   :  { %v596_v18 = vmul.f32 1.442695, %v594_v17 }
 0x614   :  { %v593_v19 = vpop.xlane.xlu1 %592 }
 0x615   :  { %1608 = vpow2.f32 %v596_v18  ;;  %v595_v20 = vsub.f32 %v587_v10, %v593_v19 }
 0x617   :  { %v598_v21 = vmul.f32 1.442695, %v595_v20 }
 0x618   :  { %v661_v22 = vpop.permute.xlu1 %660 }
 0x619   :  { %1610 = vpow2.f32 %v598_v21  ;;  %v666_v23 = vsel %vm390_vm11, %v661_v22, 0 }
 0x61a   :  { %1495 = vmatpush3.bf16.msra.mxu0 %v666_v23 }
 0x61b   :  { %1506 = vmatprep.subr.bf16.mxu0 %v1745_v15 }
 0x61c   :  { %v807_v41 = vpop.permute.xlu1 %806 }
 0x61d   :  { %v812_v55 = vsel %vm261_vm2, %v807_v41, 0 }
 0x620   :  { %v857_v43 = vpop.permute.xlu1 %856 }
 0x621   :  { %v862_v44 = vsel %vm261_vm2, %v857_v43, 0 }
 0x622   :  { %v1609_v24 = vpop.eup %1608 }
 0x623   :  { %v600_v25 = vsel %vm261_vm2, %v1609_v24, 0.0 }
 0x624   :  { %601 = vadd.xlane.f32.xlu0 %v600_v25  ;;  %v855_v45 = vpop.permute.xlu1 %854 }
 0x626   :  { %v1611_v26 = vpop.eup %1610 }
 0x627   :  { %v603_v27 = vsel %vm261_vm2, %v1611_v26, 0.0 }
 0x628   :  { %604 = vadd.xlane.f32.xlu0 %v603_v27 }
 0x63e   :  { %612 = vrot.lane.b32.xlu0 %v1857_v38, %s1753_s14 }
 0x642   :  { %804 = vrot.lane.b32.xlu0 %v1857_v38, %s1755_s21 }
 0x6ad   :  { %v602_v28 = vpop.xlane.xlu0 %601 }
 0x6ae   :  { %1612 = vrcp.f32 %v602_v28 }
 0x6b1   :  { %v605_v29 = vpop.xlane.xlu0 %604 }
 0x6b2   :  { %1614 = vrcp.f32 %v605_v29 }
 0x6b5   :  { %v613_v30 = vpop.permute.xlu0 %612 }
 0x6b6   :  { %v618_v31 = vsel %vm390_vm11, %v613_v30, 0 }
 0x6b7   :  { %1489 = vmatpush3.bf16.msra.mxu1 %v618_v31 }
 0x6b8   :  { %1500 = vmatprep.subr.bf16.mxu1 %v1745_v15 }
 0x6b9   :  { %v805_v59 = vpop.permute.xlu0 %804 }
 0x6bb   :  { %v1613_v32 = vpop.eup %1612 }
 0x6bc   :  { %v608_v33 = vmul.f32 %v1613_v32, %v1609_v24 }
 0x6be   :  { %v610_v34 = vpack.c.bf16 %v608_v33, %v608_v33 }
 0x6bf   :  { %v1615_v35 = vpop.eup %1614 }
 0x6c0   :  { %1491 = vmatmul.mubr.msk.bf16.vlgmr.msra.gmra.mxu1 %vm261_vm2, %v610_v34  ;;  %v609_v37 = vmul.f32 %v1615_v35, %v1611_v26 }
 0x6c1   :  { %1502 = vmatprep.mubr.msk.bf16.mxu1 %vm1746_vm1, %v1745_v15  ;;  %1501 = vmatpush3.bf16.msra.mxu1 %v714_v47 }
 0x6c2   :  { %v611_v39 = vpack.c.bf16 %v609_v37, %v609_v37  ;;  %1512 = vmatprep.subr.bf16.mxu1 %v1745_v15 }
 0x6c4   :  { %1497 = vmatmul.mubr.msk.bf16.vlgmr.msra.gmra.mxu0 %vm261_vm2, %v611_v39 }
 0x6c5   :  { %1507 = vmatpush3.bf16.msra.mxu0 %v761_v40  ;;  %1508 = vmatprep.mubr.msk.bf16.mxu0 %vm1746_vm1, %v1745_v15 }
 0x6c6   :  { %1518 = vmatprep.subr.bf16.mxu0 %v1745_v15 }
 0x6cc   :  { %1509 = vmatmul.mubr.msk.bf16.vlgmr.msra.gmra.mxu0 %vm261_vm2, %v482_v56 }
 0x6cd   :  { %1519 = vmatpush3.bf16.xpose.msra.mxu0 %v862_v44  ;;  %1520 = vmatprep.mubr.msk.bf16.mxu0 %vm1746_vm1, %v1745_v15 }
 0x6ce   :  { %1530 = vmatprep.subr.bf16.mxu0 %v1745_v15 }
 0x6d4   :  { %1521 = vmatmul.mubr.msk.bf16.vlgmr.msra.gmra.mxu0 %vm261_vm2, %v855_v45 }
 0x6d5   :  { %1532 = vmatprep.mubr.msk.bf16.mxu0 %vm1746_vm1, %v1745_v15 }
 0x780   :  { %v654_v48 = vpop.f32.mrf.mxu1 }
 0x782   :  { %v1492_v49 = vpop.f32.mrf.mxu1 }
 0x784   :  { %v657_v50 = vpop.f32.mrf.mxu1  ;;  %v702_v51 = vpop.f32.mrf.mxu0 }
 0x785   :  { %v708_v52 = vpack.c.bf16 %v702_v51, %v654_v48 }
 0x786   :  { %v1493_v53 = vpop.f32.mrf.mxu1  ;;  %v1498_v54 = vpop.f32.mrf.mxu0 }
 0x787   :  { %1503 = vmatmul.mubr.msk.bf16.vlgmr.msra.gmra.mxu1 %vm261_vm2, %v708_v52  ;;  %v1029_v53 = vld [vmem:[#allocation7 + $0x8] sm:$0xf] }
 0x788   :  { %1513 = vmatpush3.bf16.xpose.msra.mxu1 %v812_v55  ;;  %v705_v56 = vpop.f32.mrf.mxu0  ;;  %1514 = vmatprep.mubr.msk.bf16.mxu1 %vm1746_vm1, %v1745_v15  ;;  %v1034_v54 = vsel %vm390_vm11, %v1029_v53, 0 }
 0x789   :  { %1524 = vmatprep.subr.bf16.mxu1 %v1745_v15 }
 0x78a   :  { %v1499_v57 = vpop.f32.mrf.mxu0 }
 0x78c   :  { %v1964_v58 = vpop.f32.mrf.mxu0 }
 0x78e   :  { %v1510_v60 = vpop.f32.mrf.mxu0 }
 0x78f   :  { %1515 = vmatmul.mubr.msk.bf16.vlgmr.msra.gmra.mxu1 %vm261_vm2, %v805_v59 }
 0x790   :  { %v1967_v61 = vpop.f32.mrf.mxu0  ;;  %1526 = vmatprep.mubr.msk.bf16.mxu1 %vm1746_vm1, %v1745_v15 }
 0x792   :  { %v1511_v62 = vpop.f32.mrf.mxu0 }
 0x794   :  { %v898_v63 = vpop.f32.mrf.mxu0 }
 0x795   :  { %v905_v2 = vmul.f32 0.35355338, %v898_v63 }
 0x796   :  { %v1522_v3 = vpop.f32.mrf.mxu0 }
 0x797   :  { %v907_v4 = vadd.f32 %v905_v2, %v1881_v12 }
 0x798   :  { %v901_v5 = vpop.f32.mrf.mxu0 }
 0x799   :  { %v911_v7 = vsel %vm261_vm2, %v907_v4, -inf }
 0x79a   :  { %912 = vmax.xlane.f32.xlu1 %v911_v7  ;;  %v1523_v8 = vpop.f32.mrf.mxu0 }
 0x7ab   :  { %980 = vrot.lane.b32.xlu1 %v1860_v42, %s1756_s3 }
 0x7af   :  { %1081 = vrot.lane.b32.xlu1 %v1857_v38, %s1757_s22 }
 0x7b3   :  { %1131 = vrot.lane.b32.xlu1 %v1860_v42, %s1757_s22 }
 0x7b7   :  { %1129 = vrot.lane.b32.xlu1 %v1860_v42, %s1758_s23 }
 0x823   :  { %v913_v9 = vpop.xlane.xlu1 %912 }
 0x824   :  { %v915_v13 = vsub.f32 %v907_v4, %v913_v9 }
 0x826   :  { %v918_v14 = vmul.f32 1.442695, %v915_v13 }
 0x827   :  { %v981_v10 = vpop.permute.xlu1 %980 }
 0x828   :  { %v986_v11 = vsel %vm390_vm11, %v981_v10, 0  ;;  %1616 = vpow2.f32 %v918_v14 }
 0x829   :  { %1531 = vmatpush3.bf16.msra.mxu0 %v986_v11 }
 0x82a   :  { %1542 = vmatprep.subr.bf16.mxu0 %v1745_v15 }
 0x82b   :  { %v1082_v37 = vpop.permute.xlu1 %1081 }
 0x82c   :  { %v1087_v40 = vsel %vm261_vm2, %v1082_v37, 0 }
 0x82f   :  { %v1132_v2 = vpop.permute.xlu1 %1131 }
 0x830   :  { %v1137_v7 = vsel %vm261_vm2, %v1132_v2, 0 }
 0x833   :  { %v1130_v9 = vpop.permute.xlu1 %1129 }
 0x835   :  { %v1617_v26 = vpop.eup %1616 }
 0x836   :  { %v923_v28 = vsel %vm261_vm2, %v1617_v26, 0.0 }
 0x847   :  { %v1981_v16 = vpop.f32.mrf.mxu1 }
 0x849   :  { %v1504_v17 = vpop.f32.mrf.mxu1 }
 0x84b   :  { %v1983_v18 = vpop.f32.mrf.mxu1 }
 0x84d   :  { %v1505_v19 = vpop.f32.mrf.mxu1 }
 0x84e   :  { %v798_v19 = vadd.f32 %v1964_v58, %v1981_v16 }
 0x84f   :  { %v848_v20 = vpop.f32.mrf.mxu1 }
 0x850   :  { %v904_v21 = vmul.f32 0.35355338, %v848_v20 }
 0x851   :  { %v1516_v22 = vpop.f32.mrf.mxu1 }
 0x852   :  { %v906_v23 = vadd.f32 %v904_v21, %v1878_v6 }
 0x853   :  { %v851_v24 = vpop.f32.mrf.mxu1 }
 0x854   :  { %v908_v25 = vsel %vm261_vm2, %v906_v23, -inf }
 0x855   :  { %909 = vmax.xlane.f32.xlu0 %v908_v25  ;;  %v1517_v27 = vpop.f32.mrf.mxu1 }
 0x859   :  { %924 = vadd.xlane.f32.xlu0 %v923_v28 }
 0x8de   :  { %v910_v29 = vpop.xlane.xlu0 %909 }
 0x8df   :  { %v914_v30 = vsub.f32 %v906_v23, %v910_v29  ;;  %v801_v23 = vadd.f32 %v1967_v61, %v1983_v18 }
 0x8e1   :  { %v916_v31 = vmul.f32 1.442695, %v914_v30 }
 0x8e2   :  { %v925_v32 = vpop.xlane.xlu0 %924 }
 0x8e3   :  { %1618 = vpow2.f32 %v916_v31 }
 0x8e4   :  { %1620 = vrcp.f32 %v925_v32 }
 0x8f0   :  { %v1619_v33 = vpop.eup %1618 }
 0x8f1   :  { %v1621_v34 = vpop.eup %1620  ;;  %v920_v35 = vsel %vm261_vm2, %v1619_v33, 0.0 }
 0x8f2   :  { %921 = vadd.xlane.f32.xlu0 %v920_v35  ;;  %v929_v36 = vmul.f32 %v1621_v34, %v1617_v26 }
 0x8f4   :  { %v931_v39 = vpack.c.bf16 %v929_v36, %v929_v36 }
 0x8f6   :  { %1533 = vmatmul.mubr.msk.bf16.vlgmr.msra.gmra.mxu0 %vm261_vm2, %v931_v39 }
 0x8f7   :  { %1543 = vmatpush3.bf16.xpose.msra.mxu0 %v1087_v40  ;;  %1544 = vmatprep.mubr.msk.bf16.mxu0 %vm1746_vm1, %v1745_v15 }
 0x8f8   :  { %1554 = vmatprep.subr.bf16.mxu0 %v1745_v15 }
 0x908   :  { %932 = vrot.lane.b32.xlu0 %v1857_v38, %s1756_s3 }
 0x90c   :  { %1079 = vrot.lane.b32.xlu0 %v1857_v38, %s1758_s23 }
 0x97b   :  { %v922_v41 = vpop.xlane.xlu0 %921 }
 0x97c   :  { %1622 = vrcp.f32 %v922_v41 }
 0x97f   :  { %v933_v43 = vpop.permute.xlu0 %932 }
 0x980   :  { %v938_v44 = vsel %vm390_vm11, %v933_v43, 0 }
 0x981   :  { %1525 = vmatpush3.bf16.msra.mxu1 %v938_v44 }
 0x982   :  { %1536 = vmatprep.subr.bf16.mxu1 %v1745_v15 }
 0x983   :  { %v1080_v45 = vpop.permute.xlu0 %1079 }
 0x984   :  { %1545 = vmatmul.mubr.msk.bf16.vlgmr.msra.gmra.mxu0 %vm261_vm2, %v1080_v45 }
 0x985   :  { %1556 = vmatprep.mubr.msk.bf16.mxu0 %vm1746_vm1, %v1745_v15 }
 0x989   :  { %v1623_v46 = vpop.eup %1622 }
 0x98a   :  { %v928_v47 = vmul.f32 %v1623_v46, %v1619_v33  ;;  %v1304_v46 = vld [vmem:[#allocation7 + $0xc] sm:$0xf] }
 0x98c   :  { %v930_v48 = vpack.c.bf16 %v928_v47, %v928_v47  ;;  %v1309_v47 = vsel %vm390_vm11, %v1304_v46, 0 }
 0x98e   :  { %1527 = vmatmul.mubr.msk.bf16.vlgmr.msra.gmra.mxu1 %vm261_vm2, %v930_v48 }
 0x98f   :  { %1538 = vmatprep.mubr.msk.bf16.mxu1 %vm1746_vm1, %v1745_v15  ;;  %1537 = vmatpush3.bf16.msra.mxu1 %v1034_v54 }
 0x990   :  { %1548 = vmatprep.subr.bf16.mxu1 %v1745_v15 }
 0x9b6   :  { %v1022_v49 = vpop.f32.mrf.mxu0 }
 0x9b8   :  { %v1534_v50 = vpop.f32.mrf.mxu0 }
 0x9ba   :  { %v1025_v51 = vpop.f32.mrf.mxu0 }
 0x9bc   :  { %v1535_v52 = vpop.f32.mrf.mxu0 }
 0xa44   :  { %v1123_v55 = vpop.f32.mrf.mxu0 }
 0xa45   :  { %v1179_v56 = vmul.f32 0.35355338, %v1123_v55 }
 0xa46   :  { %v1546_v57 = vpop.f32.mrf.mxu0 }
 0xa47   :  { %v1181_v59 = vadd.f32 %v1179_v56, %v1878_v6 }
 0xa48   :  { %v1126_v60 = vpop.f32.mrf.mxu0 }
 0xa49   :  { %v1183_v62 = vsel %vm261_vm2, %v1181_v59, -inf }
 0xa4a   :  { %1184 = vmax.xlane.f32.xlu0 %v1183_v62  ;;  %v1547_v63 = vpop.f32.mrf.mxu0 }
 0xa4e   :  { %v974_v3 = vpop.f32.mrf.mxu1 }
 0xa4f   :  { %v1028_v4 = vpack.c.bf16 %v1022_v49, %v974_v3 }
 0xa50   :  { %v1528_v5 = vpop.f32.mrf.mxu1 }
 0xa51   :  { %1539 = vmatmul.mubr.msk.bf16.vlgmr.msra.gmra.mxu1 %vm261_vm2, %v1028_v4 }
 0xa52   :  { %1549 = vmatpush3.bf16.xpose.msra.mxu1 %v1137_v7  ;;  %v977_v8 = vpop.f32.mrf.mxu1  ;;  %1550 = vmatprep.mubr.msk.bf16.mxu1 %vm1746_vm1, %v1745_v15 }
 0xa53   :  { %1560 = vmatprep.subr.bf16.mxu1 %v1745_v15 }
 0xa54   :  { %v1529_v6 = vpop.f32.mrf.mxu1 }
 0xa59   :  { %1551 = vmatmul.mubr.msk.bf16.vlgmr.msra.gmra.mxu1 %vm261_vm2, %v1130_v9 }
 0xa5a   :  { %1562 = vmatprep.mubr.msk.bf16.mxu1 %vm1746_vm1, %v1745_v15 }
 0xad3   :  { %v1185_v10 = vpop.xlane.xlu0 %1184 }
 0xad4   :  { %v1189_v11 = vsub.f32 %v1181_v59, %v1185_v10  ;;  %v1400_v59 = vld [vmem:[#allocation9] ss:$0 sm:$0xff] }
 0xad6   :  { %v1191_v13 = vmul.f32 1.442695, %v1189_v11 }
 0xad8   :  { %1624 = vpow2.f32 %v1191_v13 }
 0xae5   :  { %v1625_v14 = vpop.eup %1624 }
 0xae6   :  { %v1195_v17 = vsel %vm261_vm2, %v1625_v14, 0.0 }
 0xae7   :  { %1196 = vadd.xlane.f32.xlu0 %v1195_v17 }
 0xb11   :  { %v1070_v20 = vpop.f32.mrf.mxu1 }
 0xb12   :  { %v1077_v21 = vadd.f32 %v1070_v20, %v798_v19 }
 0xb13   :  { %v1540_v22 = vpop.f32.mrf.mxu1 }
 0xb15   :  { %v1073_v24 = vpop.f32.mrf.mxu1 }
 0xb16   :  { %v1078_v25 = vadd.f32 %v1073_v24, %v801_v23 }
 0xb17   :  { %v1541_v26 = vpop.f32.mrf.mxu1 }
 0xb19   :  { %v1173_v27 = vpop.f32.mrf.mxu1 }
 0xb1a   :  { %v1180_v28 = vmul.f32 0.35355338, %v1173_v27 }
 0xb1b   :  { %v1552_v29 = vpop.f32.mrf.mxu1 }
 0xb1c   :  { %v1182_v30 = vadd.f32 %v1180_v28, %v1881_v12 }
 0xb1d   :  { %v1176_v31 = vpop.f32.mrf.mxu1 }
 0xb1e   :  { %v1186_v32 = vsel %vm261_vm2, %v1182_v30, -inf }
 0xb1f   :  { %1187 = vmax.xlane.f32.xlu1 %v1186_v32  ;;  %v1553_v33 = vpop.f32.mrf.mxu1 }
 0xb30   :  { %1255 = vrot.lane.b32.xlu1 %v1860_v42, %s1759_s24 }
 0xb70   :  { %v1197_v12 = vpop.xlane.xlu0 %1196 }
 0xba8   :  { %v1188_v58 = vpop.xlane.xlu1 %1187 }
 0xba9   :  { %v1190_v16 = vsub.f32 %v1182_v30, %v1188_v58 }
 0xbab   :  { %v1193_v34 = vmul.f32 1.442695, %v1190_v16 }
 0xbac   :  { %v1256_v61 = vpop.permute.xlu1 %1255 }
 0xbad   :  { %1626 = vpow2.f32 %v1193_v34  ;;  %v1261_v18 = vsel %vm390_vm11, %v1256_v61, 0 }
 0xbae   :  { %1561 = vmatpush3.bf16.msra.mxu1 %v1261_v18  ;;  %1628 = vrcp.f32 %v1197_v12 }
 0xbba   :  { %v1627_v35 = vpop.eup %1626 }
 0xbbb   :  { %v1198_v36 = vsel %vm261_vm2, %v1627_v35, 0.0  ;;  %v1629_v37 = vpop.eup %1628 }
 0xbbc   :  { %1199 = vadd.xlane.f32.xlu0 %v1198_v36  ;;  %v1203_v42 = vmul.f32 %v1629_v37, %v1625_v14 }
 0xbbe   :  { %v1205_v43 = vpack.c.bf16 %v1203_v42, %v1203_v42 }
 0xbd2   :  { %1207 = vrot.lane.b32.xlu0 %v1857_v38, %s1759_s24 }
 0xc45   :  { %v1200_v39 = vpop.xlane.xlu0 %1199 }
 0xc46   :  { %1630 = vrcp.f32 %v1200_v39 }
 0xc49   :  { %v1208_v40 = vpop.permute.xlu0 %1207 }
 0xc4a   :  { %v1213_v41 = vsel %vm390_vm11, %v1208_v40, 0 }
 0xc4b   :  { %1555 = vmatpush3.bf16.msra.mxu0 %v1213_v41 }
 0xc4c   :  { %1566 = vmatprep.subr.bf16.mxu0 %v1745_v15 }
 0xc4e   :  { %1557 = vmatmul.mubr.msk.bf16.vlgmr.msra.gmra.mxu0 %vm261_vm2, %v1205_v43 }
 0xc4f   :  { %1568 = vmatprep.mubr.msk.bf16.mxu0 %vm1746_vm1, %v1745_v15  ;;  %1567 = vmatpush3.bf16.msra.mxu0 %v1309_v47 }
 0xc53   :  { %v1631_v44 = vpop.eup %1630 }
 0xc54   :  { %v1204_v38 = vmul.f32 %v1631_v44, %v1627_v35 }
 0xc56   :  { %v1206_v45 = vpack.c.bf16 %v1204_v38, %v1204_v38 }
 0xc58   :  { %1563 = vmatmul.mubr.msk.bf16.vlgmr.msra.gmra.mxu1 %vm261_vm2, %v1206_v45 }
 0xd0e   :  { %v1249_v48 = vpop.f32.mrf.mxu0 }
 0xd10   :  { %v1558_v49 = vpop.f32.mrf.mxu0 }
 0xd12   :  { %v1252_v50 = vpop.f32.mrf.mxu0 }
 0xd14   :  { %v1559_v51 = vpop.f32.mrf.mxu0 }
 0xd18   :  { %v1297_v52 = vpop.f32.mrf.mxu1 }
 0xd19   :  { %v1303_v53 = vpack.c.bf16 %v1297_v52, %v1249_v48 }
 0xd1a   :  { %v1564_v54 = vpop.f32.mrf.mxu1 }
 0xd1b   :  { %1569 = vmatmul.mubr.msk.bf16.vlgmr.msra.gmra.mxu0 %vm261_vm2, %v1303_v53 }
 0xd1c   :  { %v1300_v55 = vpop.f32.mrf.mxu1 }
 0xd1e   :  { %v1565_v15 = vpop.f32.mrf.mxu1 }
 0xddb   :  { %v1345_v56 = vpop.f32.mrf.mxu0 }
 0xddc   :  { %v1352_v57 = vadd.f32 %v1345_v56, %v1077_v21 }
 0xddd   :  { %v1570_v60 = vpop.f32.mrf.mxu0 }
 0xdde   :  { %v1354_v62 = vadd.f32 %v1352_v57, %v1825_v0 }
 0xddf   :  { %v1348_v63 = vpop.f32.mrf.mxu0 }
 0xde0   :  { %v1363_v2 = vadd.f32 %v1400_v59, %v1354_v62  ;;  %v1353_v3 = vadd.f32 %v1348_v63, %v1078_v25 }
 0xde1   :  { %v1571_v4 = vpop.f32.mrf.mxu0 }
 0xde2   :  { %1365 = vst.msk [vmem:[%s2055_s8] sm:$0xff] %vm94_vm0, %v1363_v2  ;;  %v1355_v5 = vadd.f32 %v1353_v3, %v1830_v1 }
 0xde4   :  { %v1364_v7 = vadd.f32 %v1400_v59, %v1355_v5 }
 0xde6   :  { %1366 = vst.msk [vmem:[%s2055_s8 + $0x8] sm:$0xff] %vm94_vm0, %v1364_v7 }
 0xde7   :  { %1371 = vsyncpa [#allocation3], 1 }
 0xde8   :  { %1372 = vsyncpa [#allocation5], 1 }
 0xde9   :  { %1373 = vsyncpa [#allocation8], 1 }

// kernel: transformer_forward.7
= control target key start
LH: loop header
LB: loop body
LE: loop exit
PB: predicated region body
PF: predicated region fallthrough
CT: control target
= control target key end

     0   :  { %vm34_vm0 = vcmask 261120   ;;  %v1563_v14 = vmov 0.0   ;;  %vm1564_vm1 = vmmov 0   ;;  %vm201_vm2 = vcmask 64512   ;;  %s1570_s17 = smov 88   ;;  %s1571_s18 = smov 120   ;;  %s1871_s0 = inlined_call_operand.vmem [shape: f32[16,32], index: 0, kind: input, shape index: {}]   ;;  %s1872_s4 = inlined_call_operand.vmem [shape: bf16[32,96], index: 4, kind: input, shape index: {}]   ;;  %s1873_s2 = inlined_call_operand.vmem [shape: f32[1,32], index: 2, kind: input, shape index: {}]   ;;  %s1874_s3 = inlined_call_operand.vmem [shape: f32[1,32], index: 3, kind: input, shape index: {}]   ;;  %s1875_s5 = inlined_call_operand.vmem [shape: f32[1,96], index: 5, kind: input, shape index: {}]   ;;  %s1876_s1 = inlined_call_operand.vmem [shape: f32[2,8], index: 1, kind: input, shape index: {}]   ;;  %s1877_s6 = inlined_call_operand.vmem [shape: bf16[32,32], index: 6, kind: input, shape index: {}]   ;;  %s1878_s7 = inlined_call_operand.vmem [shape: f32[1,32], index: 7, kind: input, shape index: {}]   ;;  %s1879_s8 = inlined_call_operand.vmem [shape: f32[16,32], index: 8, kind: output, shape index: {}]  }
   0x1   :  { %v1627_v0 = vld [vmem:[%s1871_s0] sm:$0xff]  ;;  %v1632_v1 = vld [vmem:[%s1871_s0 + $0x8] sm:$0xff]  ;;  %1381 = vmatprep.subr.bf16.mxu0 %v1563_v14  ;;  %1385 = vmatprep.mubr.msk.bf16.mxu0 %vm1564_vm1, %v1563_v14  ;;  %v146_v47 = vlaneseq  ;;  %v1566_v48 = vmov 1966171168   ;;  %v1567_v54 = vmov 0   ;;  %vm330_vm11 = vcmask 1043456  }
   0x2   :  { %v35_v2 = vsel %vm34_vm0, %v1627_v0, 0.0  ;;  %v38_v3 = vsel %vm34_vm0, %v1632_v1, 0.0  ;;  %v1525_v15 = vld [vmem:[%s1872_s4 + $0x8] sm:$0xff]   ;;  %1389 = vmatprep.subr.bf16.mxu1 %v1563_v14  ;;  %1391 = vmatprep.mubr.msk.bf16.mxu1 %vm1564_vm1, %v1563_v14  ;;  %v1526_v16 = vld [vmem:[%s1872_s4] sm:$0xff]   ;;  %v155_v49 = vunpack.c.l.s4 %v1566_v48  ;;  %s1572_s19 = smov 56   ;;  %s1573_s20 = smov 80  }
   0x3   :  { %36 = vadd.xlane.f32.xlu0 %v35_v2  ;;  %1382 = vmatpush3.bf16.msra.mxu0 %v1525_v15  ;;  %v1311_v25 = vld [vmem:[%s1873_s2] ss:$0 sm:$0xff]  ;;  %s1565_s2 = smov 96   ;;  %v147_v51 = vshrl.u32 %v146_v47, 7  ;;  %v149_v62 = vand.u32 127, %v146_v47  ;;  %s1574_s21 = smov 112  }
   0x4   :  { %1383 = vmatprep.subr.bf16.mxu0 %v1563_v14  ;;  %v1312_v29 = vld [vmem:[%s1874_s3] ss:$0 sm:$0xff]  ;;  %v156_v52 = vunpack.c.0.s8 %v155_v49  ;;  %s1575_s26 = smov 48   ;;  %s1576_s27 = smov 72  }
   0x5   :  { %v1313_v34 = vld [vmem:[%s1875_s5] ss:$0 sm:$0xff]  ;;  %v184_v60 = vsub.s32 0, %v147_v51  ;;  %vm150_vm6 = vcmp.ge.s32.totalorder %v147_v51, %v149_v62  ;;  %s1577_s28 = smov 104   ;;  %s1578_s0 = smov 40  }
   0x6   :  { %v151_v50 = vld [vmem:[%s1876_s1] sm:$0x3]  ;;  %v159_v53 = vsub.s32 %v156_v52, %v147_v51  ;;  %s1569_s1 = smov 64  }
   0x7   :  { %39 = vadd.xlane.f32.xlu0 %v38_v3  ;;  %1384 = vmatpush3.bf16.msra.mxu0 %v1526_v16  ;;  %vm152_vm3 = vcmp.gt.f32.partialorder %v151_v50, 0.5 }
   0x8   :  { %1395 = vmatprep.subr.bf16.mxu0 %v1563_v14  ;;  %v153_v55 = vsel %vm152_vm3, 1, %v1567_v54 }
   0x9   :  { %v160_v56 = vrot.slane %v153_v55, %v159_v53 }
   0xb   :  { %v168_v57 = vrot.slane %v160_v56, %v159_v53  ;;  %v161_v58 = vcombine.high %v160_v56, %v160_v56 }
   0xd   :  { %vm176_vm4 = vcmp.ne.s32.totalorder %v168_v57, 0  ;;  %v175_v59 = vrot.slane %v161_v58, %v159_v53 }
   0xe   :  { %v180_v61 = vsel %vm176_vm4, 1, %v1567_v54 }
   0xf   :  { %vm177_vm5 = vcmp.ne.s32.totalorder %v175_v59, 0  ;;  %v185_v63 = vrot.slane %v180_v61, %v184_v60 }
  0x10   :  { %v181_v2 = vsel %vm177_vm5, 1, %v1567_v54 }
  0x11   :  { %vm190_vm7 = vcmp.eq.s32.totalorder %v185_v63, 1  ;;  %v189_v3 = vrot.slane %v181_v2, %v184_v60 }
  0x12   :  { %vm192_vm8 = vmand %vm150_vm6, %vm190_vm7 }
  0x13   :  { %vm191_vm9 = vcmp.eq.s32.totalorder %v189_v3, 1 }
  0x14   :  { %vm193_vm10 = vmand %vm150_vm6, %vm191_vm9 }
  0x8c   :  { %v37_v4 = vpop.xlane.xlu0 %36 }
  0x8d   :  { %v42_v5 = vmul.f32 0.03125, %v37_v4 }
  0x8f   :  { %v44_v6 = vsub.f32 %v1627_v0, %v42_v5  ;;  %v1568_v5 = vmov -1e+09  }
  0x90   :  { %v40_v7 = vpop.xlane.xlu0 %39 }
  0x91   :  { %v43_v8 = vmul.f32 0.03125, %v40_v7  ;;  %v46_v9 = vmul.f32 %v44_v6, %v44_v6 }
  0x93   :  { %v45_v10 = vsub.f32 %v1632_v1, %v43_v8  ;;  %v48_v11 = vsel %vm34_vm0, %v46_v9, 0.0 }
  0x94   :  { %49 = vadd.xlane.f32.xlu1 %v48_v11 }
  0x95   :  { %v47_v12 = vmul.f32 %v45_v10, %v45_v10 }
  0x97   :  { %v51_v13 = vsel %vm34_vm0, %v47_v12, 0.0  ;;  %v1692_v12 = vsel %vm193_vm10, 0.0, %v1568_v5 }
  0x98   :  { %52 = vadd.xlane.f32.xlu1 %v51_v13 }
 0x11d   :  { %v50_v17 = vpop.xlane.xlu1 %49 }
 0x11e   :  { %v54_v18 = vmul.f32 0.03125, %v50_v17 }
 0x120   :  { %v56_v19 = vadd.f32 1e-05, %v54_v18 }
 0x121   :  { %v53_v20 = vpop.xlane.xlu1 %52 }
 0x122   :  { %1527 = vrsqrt.f32 %v56_v19  ;;  %v55_v21 = vmul.f32 0.03125, %v53_v20 }
 0x124   :  { %v57_v22 = vadd.f32 1e-05, %v55_v21 }
 0x126   :  { %1529 = vrsqrt.f32 %v57_v22 }
 0x12f   :  { %v1528_v23 = vpop.eup %1527 }
 0x130   :  { %v60_v24 = vmul.f32 %v1528_v23, %v44_v6  ;;  %v1689_v6 = vsel %vm192_vm8, 0.0, %v1568_v5 }
 0x132   :  { %v68_v28 = vmul.f32 %v1311_v25, %v60_v24 }
 0x133   :  { %v1530_v26 = vpop.eup %1529 }
 0x134   :  { %v61_v27 = vmul.f32 %v1530_v26, %v45_v10  ;;  %v76_v31 = vadd.f32 %v1312_v29, %v68_v28 }
 0x136   :  { %v69_v30 = vmul.f32 %v1311_v25, %v61_v27 }
 0x138   :  { %v77_v32 = vadd.f32 %v1312_v29, %v69_v30 }
 0x13a   :  { %v78_v33 = vpack.c.bf16 %v77_v32, %v76_v31 }
 0x13c   :  { %1386 = vmatmul.mubr.msk.bf16.vlgmr.msra.gmra.mxu0 %vm34_vm0, %v78_v33 }
 0x13d   :  { %1397 = vmatprep.mubr.msk.bf16.mxu0 %vm1564_vm1, %v1563_v14 }
 0x1fc   :  { %v139_v35 = vpop.f32.mrf.mxu0 }
 0x1fd   :  { %v140_v36 = vadd.f32 %v1313_v34, %v139_v35 }
 0x1fe   :  { %v1387_v37 = vpop.f32.mrf.mxu0 }
 0x1ff   :  { %v1668_v38 = vpack.c.bf16 %v140_v36, %v140_v36 }
 0x200   :  { %v142_v39 = vpop.f32.mrf.mxu0 }
 0x201   :  { %v143_v40 = vadd.f32 %v1313_v34, %v142_v39  ;;  %199 = vrot.lane.b32.xlu0 %v1668_v38, %s1565_s2 }
 0x202   :  { %v1388_v41 = vpop.f32.mrf.mxu0 }
 0x203   :  { %v1671_v42 = vpack.c.bf16 %v143_v40, %v143_v40 }
 0x205   :  { %249 = vrot.lane.b32.xlu1 %v1671_v42, %s1565_s2 }
 0x273   :  { %v200_v43 = vpop.permute.xlu0 %199 }
 0x274   :  { %v206_v44 = vsel %vm201_vm2, %v200_v43, 0 }
 0x275   :  { %1390 = vmatpush3.bf16.xpose.msra.mxu1 %v206_v44 }
 0x276   :  { %1401 = vmatprep.subr.bf16.mxu1 %v1563_v14 }
 0x277   :  { %v250_v45 = vpop.permute.xlu1 %249 }
 0x278   :  { %v255_v46 = vsel %vm201_vm2, %v250_v45, 0 }
 0x279   :  { %1396 = vmatpush3.bf16.xpose.msra.mxu0 %v255_v46 }
 0x27a   :  { %1407 = vmatprep.subr.bf16.mxu0 %v1563_v14 }
 0x27c   :  { %1392 = vmatmul.mubr.msk.bf16.vlgmr.msra.gmra.mxu1 %vm201_vm2, %v1668_v38 }
 0x27d   :  { %1403 = vmatprep.mubr.msk.bf16.mxu1 %vm1564_vm1, %v1563_v14 }
 0x280   :  { %1398 = vmatmul.mubr.msk.bf16.vlgmr.msra.gmra.mxu0 %vm201_vm2, %v1671_v42 }
 0x281   :  { %1409 = vmatprep.mubr.msk.bf16.mxu0 %vm1564_vm1, %v1563_v14 }
 0x33c   :  { %v242_v4 = vpop.f32.mrf.mxu1 }
 0x33d   :  { %v297_v7 = vmul.f32 0.35355338, %v242_v4 }
 0x33e   :  { %v1393_v8 = vpop.f32.mrf.mxu1 }
 0x33f   :  { %v299_v9 = vadd.f32 %v297_v7, %v1689_v6 }
 0x340   :  { %v245_v10 = vpop.f32.mrf.mxu1  ;;  %v291_v11 = vpop.f32.mrf.mxu0 }
 0x341   :  { %v298_v13 = vmul.f32 0.35355338, %v291_v11  ;;  %v301_v15 = vsel %vm201_vm2, %v299_v9, -inf }
 0x342   :  { %v1394_v16 = vpop.f32.mrf.mxu1  ;;  %302 = vmax.xlane.f32.xlu1 %v301_v15  ;;  %v1399_v17 = vpop.f32.mrf.mxu0 }
 0x343   :  { %v300_v18 = vadd.f32 %v298_v13, %v1692_v12 }
 0x344   :  { %v294_v19 = vpop.f32.mrf.mxu0 }
 0x345   :  { %v304_v20 = vsel %vm201_vm2, %v300_v18, -inf }
 0x346   :  { %305 = vmax.xlane.f32.xlu0 %v304_v20  ;;  %v1400_v21 = vpop.f32.mrf.mxu0 }
 0x353   :  { %374 = vrot.lane.b32.xlu1 %v1671_v42, %s1569_s1 }
 0x357   :  { %426 = vrot.lane.b32.xlu1 %v1668_v38, %s1570_s17 }
 0x3cb   :  { %v303_v22 = vpop.xlane.xlu1 %302 }
 0x3cc   :  { %v307_v23 = vsub.f32 %v299_v9, %v303_v22 }
 0x3ce   :  { %v309_v24 = vmul.f32 1.442695, %v307_v23 }
 0x3cf   :  { %v375_v25 = vpop.permute.xlu1 %374  ;;  %v306_v26 = vpop.xlane.xlu0 %305 }
 0x3d0   :  { %1531 = vpow2.f32 %v309_v24  ;;  %v380_v27 = vsel %vm330_vm11, %v375_v25, 0  ;;  %v308_v28 = vsub.f32 %v300_v18, %v306_v26 }
 0x3d1   :  { %1408 = vmatpush3.bf16.msra.mxu0 %v380_v27 }
 0x3d2   :  { %v311_v29 = vmul.f32 1.442695, %v308_v28  ;;  %1419 = vmatprep.subr.bf16.mxu0 %v1563_v14 }
 0x3d3   :  { %v427_v34 = vpop.permute.xlu1 %426 }
 0x3d4   :  { %1533 = vpow2.f32 %v311_v29  ;;  %v432_v45 = vsel %vm201_vm2, %v427_v34, 0 }
 0x3dd   :  { %v1532_v30 = vpop.eup %1531 }
 0x3de   :  { %v313_v31 = vsel %vm201_vm2, %v1532_v30, 0.0 }
 0x3df   :  { %314 = vadd.xlane.f32.xlu0 %v313_v31 }
 0x3e1   :  { %v1534_v32 = vpop.eup %1533 }
 0x3e2   :  { %v316_v33 = vsel %vm201_vm2, %v1534_v32, 0.0 }
 0x3e3   :  { %317 = vadd.xlane.f32.xlu1 %v316_v33 }
 0x3f4   :  { %476 = vrot.lane.b32.xlu1 %v1671_v42, %s1570_s17 }
 0x3f5   :  { %325 = vrot.lane.b32.xlu0 %v1668_v38, %s1569_s1 }
 0x3f8   :  { %474 = vrot.lane.b32.xlu1 %v1671_v42, %s1571_s18 }
 0x3f9   :  { %424 = vrot.lane.b32.xlu0 %v1668_v38, %s1571_s18 }
 0x468   :  { %v315_v35 = vpop.xlane.xlu0 %314 }
 0x469   :  { %1535 = vrcp.f32 %v315_v35 }
 0x46c   :  { %v318_v36 = vpop.xlane.xlu1 %317  ;;  %v326_v37 = vpop.permute.xlu0 %325 }
 0x46d   :  { %1537 = vrcp.f32 %v318_v36  ;;  %v332_v39 = vsel %vm330_vm11, %v326_v37, 0  ;;  %v423_v36 = vld [vmem:[%s1877_s6] sm:$0xf] }
 0x46e   :  { %1402 = vmatpush3.bf16.msra.mxu1 %v332_v39 }
 0x46f   :  { %1413 = vmatprep.subr.bf16.mxu1 %v1563_v14 }
 0x470   :  { %v477_v47 = vpop.permute.xlu1 %476  ;;  %v425_v50 = vpop.permute.xlu0 %424 }
 0x471   :  { %v482_v49 = vsel %vm201_vm2, %v477_v47, 0 }
 0x474   :  { %v475_v51 = vpop.permute.xlu1 %474 }
 0x476   :  { %v1536_v40 = vpop.eup %1535 }
 0x477   :  { %v321_v41 = vmul.f32 %v1536_v40, %v1532_v30  ;;  %v701_v40 = vsel %vm330_vm11, %v423_v36, 0 }
 0x479   :  { %v323_v43 = vpack.c.bf16 %v321_v41, %v321_v41 }
 0x47a   :  { %v1538_v44 = vpop.eup %1537 }
 0x47b   :  { %1404 = vmatmul.mubr.msk.bf16.vlgmr.msra.gmra.mxu1 %vm201_vm2, %v323_v43  ;;  %v322_v46 = vmul.f32 %v1538_v44, %v1534_v32 }
 0x47c   :  { %1414 = vmatpush3.bf16.xpose.msra.mxu1 %v432_v45  ;;  %1415 = vmatprep.mubr.msk.bf16.mxu1 %vm1564_vm1, %v1563_v14 }
 0x47d   :  { %v324_v48 = vpack.c.bf16 %v322_v46, %v322_v46  ;;  %1425 = vmatprep.subr.bf16.mxu1 %v1563_v14  ;;  %v649_v46 = vld [vmem:[%s1877_s6 + $0x4] sm:$0xf] }
 0x47e   :  { %v654_v47 = vsel %vm330_vm11, %v649_v46, 0 }
 0x47f   :  { %1410 = vmatmul.mubr.msk.bf16.vlgmr.msra.gmra.mxu0 %vm201_vm2, %v324_v48 }
 0x480   :  { %1420 = vmatpush3.bf16.xpose.msra.mxu0 %v482_v49  ;;  %1421 = vmatprep.mubr.msk.bf16.mxu0 %vm1564_vm1, %v1563_v14 }
 0x481   :  { %1431 = vmatprep.subr.bf16.mxu0 %v1563_v14 }
 0x483   :  { %1416 = vmatmul.mubr.msk.bf16.vlgmr.msra.gmra.mxu1 %vm201_vm2, %v425_v50 }
 0x484   :  { %1427 = vmatprep.mubr.msk.bf16.mxu1 %vm1564_vm1, %v1563_v14 }
 0x487   :  { %1422 = vmatmul.mubr.msk.bf16.vlgmr.msra.gmra.mxu0 %vm201_vm2, %v475_v51 }
 0x488   :  { %1433 = vmatprep.mubr.msk.bf16.mxu0 %vm1564_vm1, %v1563_v14 }
 0x53b   :  { %v1725_v52 = vpop.f32.mrf.mxu1 }
 0x53d   :  { %v1405_v53 = vpop.f32.mrf.mxu1 }
 0x53f   :  { %v371_v54 = vpop.f32.mrf.mxu1  ;;  %v1727_v55 = vpop.f32.mrf.mxu0 }
 0x540   :  { %v422_v56 = vpack.c.bf16 %v1727_v55, %v1725_v52 }
 0x541   :  { %v1406_v57 = vpop.f32.mrf.mxu1  ;;  %v1411_v58 = vpop.f32.mrf.mxu0 }
 0x543   :  { %v419_v59 = vpop.f32.mrf.mxu0  ;;  %v468_v60 = vpop.f32.mrf.mxu1 }
 0x544   :  { %v524_v61 = vmul.f32 0.35355338, %v468_v60 }
 0x545   :  { %v1412_v62 = vpop.f32.mrf.mxu0  ;;  %v1417_v63 = vpop.f32.mrf.mxu1 }
 0x546   :  { %v526_v2 = vadd.f32 %v524_v61, %v1689_v6 }
 0x547   :  { %v471_v3 = vpop.f32.mrf.mxu1  ;;  %v518_v4 = vpop.f32.mrf.mxu0 }
 0x548   :  { %v525_v5 = vmul.f32 0.35355338, %v518_v4  ;;  %v528_v7 = vsel %vm201_vm2, %v526_v2, -inf }
 0x549   :  { %529 = vmax.xlane.f32.xlu0 %v528_v7  ;;  %v1418_v8 = vpop.f32.mrf.mxu1  ;;  %v1423_v9 = vpop.f32.mrf.mxu0 }
 0x54a   :  { %v527_v10 = vadd.f32 %v525_v5, %v1692_v12 }
 0x54b   :  { %v521_v11 = vpop.f32.mrf.mxu0 }
 0x54c   :  { %v531_v13 = vsel %vm201_vm2, %v527_v10, -inf }
 0x54d   :  { %532 = vmax.xlane.f32.xlu1 %v531_v13  ;;  %v1424_v15 = vpop.f32.mrf.mxu0 }
 0x55e   :  { %600 = vrot.lane.b32.xlu1 %v1671_v42, %s1572_s19 }
 0x562   :  { %746 = vrot.lane.b32.xlu1 %v1668_v38, %s1573_s20 }
 0x566   :  { %796 = vrot.lane.b32.xlu1 %v1671_v42, %s1573_s20 }
 0x56a   :  { %794 = vrot.lane.b32.xlu1 %v1671_v42, %s1574_s21 }
 0x5d2   :  { %v530_v16 = vpop.xlane.xlu0 %529 }
 0x5d3   :  { %v534_v17 = vsub.f32 %v526_v2, %v530_v16 }
 0x5d5   :  { %v536_v18 = vmul.f32 1.442695, %v534_v17 }
 0x5d6   :  { %v533_v19 = vpop.xlane.xlu1 %532 }
 0x5d7   :  { %1539 = vpow2.f32 %v536_v18  ;;  %v535_v20 = vsub.f32 %v527_v10, %v533_v19 }
 0x5d9   :  { %v538_v21 = vmul.f32 1.442695, %v535_v20 }
 0x5da   :  { %v601_v22 = vpop.permute.xlu1 %600 }
 0x5db   :  { %1541 = vpow2.f32 %v538_v21  ;;  %v606_v23 = vsel %vm330_vm11, %v601_v22, 0 }
 0x5dc   :  { %1432 = vmatpush3.bf16.msra.mxu0 %v606_v23 }
 0x5dd   :  { %1443 = vmatprep.subr.bf16.mxu0 %v1563_v14 }
 0x5de   :  { %v747_v41 = vpop.permute.xlu1 %746 }
 0x5df   :  { %v752_v55 = vsel %vm201_vm2, %v747_v41, 0 }
 0x5e2   :  { %v797_v43 = vpop.permute.xlu1 %796 }
 0x5e3   :  { %v802_v44 = vsel %vm201_vm2, %v797_v43, 0 }
 0x5e4   :  { %v1540_v24 = vpop.eup %1539 }
 0x5e5   :  { %v540_v25 = vsel %vm201_vm2, %v1540_v24, 0.0 }
 0x5e6   :  { %541 = vadd.xlane.f32.xlu0 %v540_v25  ;;  %v795_v45 = vpop.permute.xlu1 %794 }
 0x5e8   :  { %v1542_v26 = vpop.eup %1541 }
 0x5e9   :  { %v543_v27 = vsel %vm201_vm2, %v1542_v26, 0.0 }
 0x5ea   :  { %544 = vadd.xlane.f32.xlu0 %v543_v27 }
 0x600   :  { %552 = vrot.lane.b32.xlu0 %v1668_v38, %s1572_s19 }
 0x604   :  { %744 = vrot.lane.b32.xlu0 %v1668_v38, %s1574_s21 }
 0x66f   :  { %v542_v28 = vpop.xlane.xlu0 %541 }
 0x670   :  { %1543 = vrcp.f32 %v542_v28 }
 0x673   :  { %v545_v29 = vpop.xlane.xlu0 %544 }
 0x674   :  { %1545 = vrcp.f32 %v545_v29 }
 0x677   :  { %v553_v30 = vpop.permute.xlu0 %552 }
 0x678   :  { %v558_v31 = vsel %vm330_vm11, %v553_v30, 0 }
 0x679   :  { %1426 = vmatpush3.bf16.msra.mxu1 %v558_v31 }
 0x67a   :  { %1437 = vmatprep.subr.bf16.mxu1 %v1563_v14 }
 0x67b   :  { %v745_v59 = vpop.permute.xlu0 %744 }
 0x67d   :  { %v1544_v32 = vpop.eup %1543 }
 0x67e   :  { %v548_v33 = vmul.f32 %v1544_v32, %v1540_v24 }
 0x680   :  { %v550_v34 = vpack.c.bf16 %v548_v33, %v548_v33 }
 0x681   :  { %v1546_v35 = vpop.eup %1545 }
 0x682   :  { %1428 = vmatmul.mubr.msk.bf16.vlgmr.msra.gmra.mxu1 %vm201_vm2, %v550_v34  ;;  %v549_v37 = vmul.f32 %v1546_v35, %v1542_v26 }
 0x683   :  { %1439 = vmatprep.mubr.msk.bf16.mxu1 %vm1564_vm1, %v1563_v14  ;;  %1438 = vmatpush3.bf16.msra.mxu1 %v654_v47 }
 0x684   :  { %v551_v39 = vpack.c.bf16 %v549_v37, %v549_v37  ;;  %1449 = vmatprep.subr.bf16.mxu1 %v1563_v14 }
 0x686   :  { %1434 = vmatmul.mubr.msk.bf16.vlgmr.msra.gmra.mxu0 %vm201_vm2, %v551_v39 }
 0x687   :  { %1444 = vmatpush3.bf16.msra.mxu0 %v701_v40  ;;  %1445 = vmatprep.mubr.msk.bf16.mxu0 %vm1564_vm1, %v1563_v14 }
 0x688   :  { %1455 = vmatprep.subr.bf16.mxu0 %v1563_v14 }
 0x68e   :  { %1446 = vmatmul.mubr.msk.bf16.vlgmr.msra.gmra.mxu0 %vm201_vm2, %v422_v56 }
 0x68f   :  { %1456 = vmatpush3.bf16.xpose.msra.mxu0 %v802_v44  ;;  %1457 = vmatprep.mubr.msk.bf16.mxu0 %vm1564_vm1, %v1563_v14 }
 0x690   :  { %1467 = vmatprep.subr.bf16.mxu0 %v1563_v14 }
 0x696   :  { %1458 = vmatmul.mubr.msk.bf16.vlgmr.msra.gmra.mxu0 %vm201_vm2, %v795_v45 }
 0x697   :  { %1469 = vmatprep.mubr.msk.bf16.mxu0 %vm1564_vm1, %v1563_v14 }
 0x742   :  { %v594_v48 = vpop.f32.mrf.mxu1 }
 0x744   :  { %v1429_v49 = vpop.f32.mrf.mxu1 }
 0x746   :  { %v597_v50 = vpop.f32.mrf.mxu1  ;;  %v642_v51 = vpop.f32.mrf.mxu0 }
 0x747   :  { %v648_v52 = vpack.c.bf16 %v642_v51, %v594_v48 }
 0x748   :  { %v1430_v53 = vpop.f32.mrf.mxu1  ;;  %v1435_v54 = vpop.f32.mrf.mxu0 }
 0x749   :  { %1440 = vmatmul.mubr.msk.bf16.vlgmr.msra.gmra.mxu1 %vm201_vm2, %v648_v52  ;;  %v969_v53 = vld [vmem:[%s1877_s6 + $0x8] sm:$0xf] }
 0x74a   :  { %1450 = vmatpush3.bf16.xpose.msra.mxu1 %v752_v55  ;;  %v645_v56 = vpop.f32.mrf.mxu0  ;;  %1451 = vmatprep.mubr.msk.bf16.mxu1 %vm1564_vm1, %v1563_v14  ;;  %v974_v54 = vsel %vm330_vm11, %v969_v53, 0 }
 0x74b   :  { %1461 = vmatprep.subr.bf16.mxu1 %v1563_v14 }
 0x74c   :  { %v1436_v57 = vpop.f32.mrf.mxu0 }
 0x74e   :  { %v1779_v58 = vpop.f32.mrf.mxu0 }
 0x750   :  { %v1447_v60 = vpop.f32.mrf.mxu0 }
 0x751   :  { %1452 = vmatmul.mubr.msk.bf16.vlgmr.msra.gmra.mxu1 %vm201_vm2, %v745_v59 }
 0x752   :  { %v1782_v61 = vpop.f32.mrf.mxu0  ;;  %1463 = vmatprep.mubr.msk.bf16.mxu1 %vm1564_vm1, %v1563_v14 }
 0x754   :  { %v1448_v62 = vpop.f32.mrf.mxu0 }
 0x756   :  { %v838_v63 = vpop.f32.mrf.mxu0 }
 0x757   :  { %v845_v2 = vmul.f32 0.35355338, %v838_v63 }
 0x758   :  { %v1459_v3 = vpop.f32.mrf.mxu0 }
 0x759   :  { %v847_v4 = vadd.f32 %v845_v2, %v1692_v12 }
 0x75a   :  { %v841_v5 = vpop.f32.mrf.mxu0 }
 0x75b   :  { %v851_v7 = vsel %vm201_vm2, %v847_v4, -inf }
 0x75c   :  { %852 = vmax.xlane.f32.xlu1 %v851_v7  ;;  %v1460_v8 = vpop.f32.mrf.mxu0 }
 0x76d   :  { %920 = vrot.lane.b32.xlu1 %v1671_v42, %s1575_s26 }
 0x771   :  { %1021 = vrot.lane.b32.xlu1 %v1668_v38, %s1576_s27 }
 0x775   :  { %1071 = vrot.lane.b32.xlu1 %v1671_v42, %s1576_s27 }
 0x779   :  { %1069 = vrot.lane.b32.xlu1 %v1671_v42, %s1577_s28 }
 0x7e5   :  { %v853_v9 = vpop.xlane.xlu1 %852 }
 0x7e6   :  { %v855_v13 = vsub.f32 %v847_v4, %v853_v9 }
 0x7e8   :  { %v858_v15 = vmul.f32 1.442695, %v855_v13 }
 0x7e9   :  { %v921_v10 = vpop.permute.xlu1 %920 }
 0x7ea   :  { %v926_v11 = vsel %vm330_vm11, %v921_v10, 0  ;;  %1547 = vpow2.f32 %v858_v15 }
 0x7eb   :  { %1468 = vmatpush3.bf16.msra.mxu0 %v926_v11 }
 0x7ec   :  { %1479 = vmatprep.subr.bf16.mxu0 %v1563_v14 }
 0x7ed   :  { %v1022_v37 = vpop.permute.xlu1 %1021 }
 0x7ee   :  { %v1027_v40 = vsel %vm201_vm2, %v1022_v37, 0 }
 0x7f1   :  { %v1072_v2 = vpop.permute.xlu1 %1071 }
 0x7f2   :  { %v1077_v7 = vsel %vm201_vm2, %v1072_v2, 0 }
 0x7f5   :  { %v1070_v9 = vpop.permute.xlu1 %1069 }
 0x7f7   :  { %v1548_v26 = vpop.eup %1547 }
 0x7f8   :  { %v863_v28 = vsel %vm201_vm2, %v1548_v26, 0.0 }
 0x809   :  { %v1796_v16 = vpop.f32.mrf.mxu1 }
 0x80b   :  { %v1441_v17 = vpop.f32.mrf.mxu1 }
 0x80d   :  { %v1798_v18 = vpop.f32.mrf.mxu1 }
 0x80f   :  { %v1442_v19 = vpop.f32.mrf.mxu1 }
 0x810   :  { %v738_v19 = vadd.f32 %v1779_v58, %v1796_v16 }
 0x811   :  { %v788_v20 = vpop.f32.mrf.mxu1 }
 0x812   :  { %v844_v21 = vmul.f32 0.35355338, %v788_v20 }
 0x813   :  { %v1453_v22 = vpop.f32.mrf.mxu1 }
 0x814   :  { %v846_v23 = vadd.f32 %v844_v21, %v1689_v6 }
 0x815   :  { %v791_v24 = vpop.f32.mrf.mxu1 }
 0x816   :  { %v848_v25 = vsel %vm201_vm2, %v846_v23, -inf }
 0x817   :  { %849 = vmax.xlane.f32.xlu0 %v848_v25  ;;  %v1454_v27 = vpop.f32.mrf.mxu1 }
 0x81b   :  { %864 = vadd.xlane.f32.xlu0 %v863_v28 }
 0x8a0   :  { %v850_v29 = vpop.xlane.xlu0 %849 }
 0x8a1   :  { %v854_v30 = vsub.f32 %v846_v23, %v850_v29  ;;  %v741_v23 = vadd.f32 %v1782_v61, %v1798_v18 }
 0x8a3   :  { %v856_v31 = vmul.f32 1.442695, %v854_v30 }
 0x8a4   :  { %v865_v32 = vpop.xlane.xlu0 %864 }
 0x8a5   :  { %1549 = vpow2.f32 %v856_v31 }
 0x8a6   :  { %1551 = vrcp.f32 %v865_v32 }
 0x8b2   :  { %v1550_v33 = vpop.eup %1549 }
 0x8b3   :  { %v1552_v34 = vpop.eup %1551  ;;  %v860_v35 = vsel %vm201_vm2, %v1550_v33, 0.0 }
 0x8b4   :  { %861 = vadd.xlane.f32.xlu0 %v860_v35  ;;  %v869_v36 = vmul.f32 %v1552_v34, %v1548_v26 }
 0x8b6   :  { %v871_v39 = vpack.c.bf16 %v869_v36, %v869_v36 }
 0x8b8   :  { %1470 = vmatmul.mubr.msk.bf16.vlgmr.msra.gmra.mxu0 %vm201_vm2, %v871_v39 }
 0x8b9   :  { %1480 = vmatpush3.bf16.xpose.msra.mxu0 %v1027_v40  ;;  %1481 = vmatprep.mubr.msk.bf16.mxu0 %vm1564_vm1, %v1563_v14 }
 0x8ba   :  { %1491 = vmatprep.subr.bf16.mxu0 %v1563_v14 }
 0x8ca   :  { %872 = vrot.lane.b32.xlu0 %v1668_v38, %s1575_s26 }
 0x8ce   :  { %1019 = vrot.lane.b32.xlu0 %v1668_v38, %s1577_s28 }
 0x93d   :  { %v862_v41 = vpop.xlane.xlu0 %861 }
 0x93e   :  { %1553 = vrcp.f32 %v862_v41 }
 0x941   :  { %v873_v43 = vpop.permute.xlu0 %872 }
 0x942   :  { %v878_v44 = vsel %vm330_vm11, %v873_v43, 0 }
 0x943   :  { %1462 = vmatpush3.bf16.msra.mxu1 %v878_v44 }
 0x944   :  { %1473 = vmatprep.subr.bf16.mxu1 %v1563_v14 }
 0x945   :  { %v1020_v45 = vpop.permute.xlu0 %1019 }
 0x946   :  { %1482 = vmatmul.mubr.msk.bf16.vlgmr.msra.gmra.mxu0 %vm201_vm2, %v1020_v45 }
 0x947   :  { %1493 = vmatprep.mubr.msk.bf16.mxu0 %vm1564_vm1, %v1563_v14 }
 0x94b   :  { %v1554_v46 = vpop.eup %1553 }
 0x94c   :  { %v868_v47 = vmul.f32 %v1554_v46, %v1550_v33  ;;  %v1244_v46 = vld [vmem:[%s1877_s6 + $0xc] sm:$0xf] }
 0x94e   :  { %v870_v48 = vpack.c.bf16 %v868_v47, %v868_v47  ;;  %v1249_v47 = vsel %vm330_vm11, %v1244_v46, 0 }
 0x950   :  { %1464 = vmatmul.mubr.msk.bf16.vlgmr.msra.gmra.mxu1 %vm201_vm2, %v870_v48 }
 0x951   :  { %1475 = vmatprep.mubr.msk.bf16.mxu1 %vm1564_vm1, %v1563_v14  ;;  %1474 = vmatpush3.bf16.msra.mxu1 %v974_v54 }
 0x952   :  { %1485 = vmatprep.subr.bf16.mxu1 %v1563_v14 }
 0x978   :  { %v962_v49 = vpop.f32.mrf.mxu0 }
 0x97a   :  { %v1471_v50 = vpop.f32.mrf.mxu0 }
 0x97c   :  { %v965_v51 = vpop.f32.mrf.mxu0 }
 0x97e   :  { %v1472_v52 = vpop.f32.mrf.mxu0 }
 0xa06   :  { %v1063_v55 = vpop.f32.mrf.mxu0 }
 0xa07   :  { %v1119_v56 = vmul.f32 0.35355338, %v1063_v55 }
 0xa08   :  { %v1483_v57 = vpop.f32.mrf.mxu0 }
 0xa09   :  { %v1121_v59 = vadd.f32 %v1119_v56, %v1689_v6 }
 0xa0a   :  { %v1066_v60 = vpop.f32.mrf.mxu0 }
 0xa0b   :  { %v1123_v62 = vsel %vm201_vm2, %v1121_v59, -inf }
 0xa0c   :  { %1124 = vmax.xlane.f32.xlu0 %v1123_v62  ;;  %v1484_v63 = vpop.f32.mrf.mxu0 }
 0xa10   :  { %v914_v3 = vpop.f32.mrf.mxu1 }
 0xa11   :  { %v968_v4 = vpack.c.bf16 %v962_v49, %v914_v3 }
 0xa12   :  { %v1465_v5 = vpop.f32.mrf.mxu1 }
 0xa13   :  { %1476 = vmatmul.mubr.msk.bf16.vlgmr.msra.gmra.mxu1 %vm201_vm2, %v968_v4 }
 0xa14   :  { %1486 = vmatpush3.bf16.xpose.msra.mxu1 %v1077_v7  ;;  %v917_v8 = vpop.f32.mrf.mxu1  ;;  %1487 = vmatprep.mubr.msk.bf16.mxu1 %vm1564_vm1, %v1563_v14 }
 0xa15   :  { %1497 = vmatprep.subr.bf16.mxu1 %v1563_v14 }
 0xa16   :  { %v1466_v6 = vpop.f32.mrf.mxu1 }
 0xa1b   :  { %1488 = vmatmul.mubr.msk.bf16.vlgmr.msra.gmra.mxu1 %vm201_vm2, %v1070_v9 }
 0xa1c   :  { %1499 = vmatprep.mubr.msk.bf16.mxu1 %vm1564_vm1, %v1563_v14 }
 0xa95   :  { %v1125_v10 = vpop.xlane.xlu0 %1124 }
 0xa96   :  { %v1129_v11 = vsub.f32 %v1121_v59, %v1125_v10  ;;  %v1337_v59 = vld [vmem:[%s1878_s7] ss:$0 sm:$0xff] }
 0xa98   :  { %v1131_v13 = vmul.f32 1.442695, %v1129_v11 }
 0xa9a   :  { %1555 = vpow2.f32 %v1131_v13 }
 0xaa7   :  { %v1556_v15 = vpop.eup %1555 }
 0xaa8   :  { %v1135_v17 = vsel %vm201_vm2, %v1556_v15, 0.0 }
 0xaa9   :  { %1136 = vadd.xlane.f32.xlu0 %v1135_v17 }
 0xad3   :  { %v1010_v20 = vpop.f32.mrf.mxu1 }
 0xad4   :  { %v1017_v21 = vadd.f32 %v1010_v20, %v738_v19 }
 0xad5   :  { %v1477_v22 = vpop.f32.mrf.mxu1 }
 0xad7   :  { %v1013_v24 = vpop.f32.mrf.mxu1 }
 0xad8   :  { %v1018_v25 = vadd.f32 %v1013_v24, %v741_v23 }
 0xad9   :  { %v1478_v26 = vpop.f32.mrf.mxu1 }
 0xadb   :  { %v1113_v27 = vpop.f32.mrf.mxu1 }
 0xadc   :  { %v1120_v28 = vmul.f32 0.35355338, %v1113_v27 }
 0xadd   :  { %v1489_v29 = vpop.f32.mrf.mxu1 }
 0xade   :  { %v1122_v30 = vadd.f32 %v1120_v28, %v1692_v12 }
 0xadf   :  { %v1116_v31 = vpop.f32.mrf.mxu1 }
 0xae0   :  { %v1126_v32 = vsel %vm201_vm2, %v1122_v30, -inf }
 0xae1   :  { %1127 = vmax.xlane.f32.xlu1 %v1126_v32  ;;  %v1490_v33 = vpop.f32.mrf.mxu1 }
 0xaf2   :  { %1195 = vrot.lane.b32.xlu1 %v1671_v42, %s1578_s0 }
 0xb32   :  { %v1137_v12 = vpop.xlane.xlu0 %1136 }
 0xb6a   :  { %v1128_v58 = vpop.xlane.xlu1 %1127 }
 0xb6b   :  { %v1130_v16 = vsub.f32 %v1122_v30, %v1128_v58 }
 0xb6d   :  { %v1133_v34 = vmul.f32 1.442695, %v1130_v16 }
 0xb6e   :  { %v1196_v61 = vpop.permute.xlu1 %1195 }
 0xb6f   :  { %1557 = vpow2.f32 %v1133_v34  ;;  %v1201_v18 = vsel %vm330_vm11, %v1196_v61, 0 }
 0xb70   :  { %1498 = vmatpush3.bf16.msra.mxu1 %v1201_v18  ;;  %1559 = vrcp.f32 %v1137_v12 }
 0xb7c   :  { %v1558_v35 = vpop.eup %1557 }
 0xb7d   :  { %v1138_v36 = vsel %vm201_vm2, %v1558_v35, 0.0  ;;  %v1560_v37 = vpop.eup %1559 }
 0xb7e   :  { %1139 = vadd.xlane.f32.xlu0 %v1138_v36  ;;  %v1143_v42 = vmul.f32 %v1560_v37, %v1556_v15 }
 0xb80   :  { %v1145_v43 = vpack.c.bf16 %v1143_v42, %v1143_v42 }
 0xb94   :  { %1147 = vrot.lane.b32.xlu0 %v1668_v38, %s1578_s0 }
 0xc07   :  { %v1140_v39 = vpop.xlane.xlu0 %1139 }
 0xc08   :  { %1561 = vrcp.f32 %v1140_v39 }
 0xc0b   :  { %v1148_v40 = vpop.permute.xlu0 %1147 }
 0xc0c   :  { %v1153_v41 = vsel %vm330_vm11, %v1148_v40, 0 }
 0xc0d   :  { %1492 = vmatpush3.bf16.msra.mxu0 %v1153_v41 }
 0xc0e   :  { %1503 = vmatprep.subr.bf16.mxu0 %v1563_v14 }
 0xc10   :  { %1494 = vmatmul.mubr.msk.bf16.vlgmr.msra.gmra.mxu0 %vm201_vm2, %v1145_v43 }
 0xc11   :  { %1505 = vmatprep.mubr.msk.bf16.mxu0 %vm1564_vm1, %v1563_v14  ;;  %1504 = vmatpush3.bf16.msra.mxu0 %v1249_v47 }
 0xc15   :  { %v1562_v44 = vpop.eup %1561 }
 0xc16   :  { %v1144_v38 = vmul.f32 %v1562_v44, %v1558_v35 }
 0xc18   :  { %v1146_v45 = vpack.c.bf16 %v1144_v38, %v1144_v38 }
 0xc1a   :  { %1500 = vmatmul.mubr.msk.bf16.vlgmr.msra.gmra.mxu1 %vm201_vm2, %v1146_v45 }
 0xcd0   :  { %v1189_v48 = vpop.f32.mrf.mxu0 }
 0xcd2   :  { %v1495_v49 = vpop.f32.mrf.mxu0 }
 0xcd4   :  { %v1192_v50 = vpop.f32.mrf.mxu0 }
 0xcd6   :  { %v1496_v51 = vpop.f32.mrf.mxu0 }
 0xcda   :  { %v1237_v52 = vpop.f32.mrf.mxu1 }
 0xcdb   :  { %v1243_v53 = vpack.c.bf16 %v1237_v52, %v1189_v48 }
 0xcdc   :  { %v1501_v54 = vpop.f32.mrf.mxu1 }
 0xcdd   :  { %1506 = vmatmul.mubr.msk.bf16.vlgmr.msra.gmra.mxu0 %vm201_vm2, %v1243_v53 }
 0xcde   :  { %v1240_v14 = vpop.f32.mrf.mxu1 }
 0xce0   :  { %v1502_v55 = vpop.f32.mrf.mxu1 }
 0xd9d   :  { %v1285_v56 = vpop.f32.mrf.mxu0 }
 0xd9e   :  { %v1292_v57 = vadd.f32 %v1285_v56, %v1017_v21 }
 0xd9f   :  { %v1507_v60 = vpop.f32.mrf.mxu0 }
 0xda0   :  { %v1294_v62 = vadd.f32 %v1292_v57, %v1627_v0 }
 0xda1   :  { %v1288_v63 = vpop.f32.mrf.mxu0 }
 0xda2   :  { %v1303_v2 = vadd.f32 %v1337_v59, %v1294_v62  ;;  %v1293_v3 = vadd.f32 %v1288_v63, %v1018_v25 }
 0xda3   :  { %v1508_v4 = vpop.f32.mrf.mxu0 }
 0xda4   :  { %1305 = vst.msk [vmem:[%s1879_s8] sm:$0xff] %vm34_vm0, %v1303_v2  ;;  %v1295_v5 = vadd.f32 %v1293_v3, %v1632_v1 }
 0xda6   :  { %v1304_v7 = vadd.f32 %v1337_v59, %v1295_v5 }
 0xda8   :  { %1306 = vst.msk [vmem:[%s1879_s8 + $0x8] sm:$0xff] %vm34_vm0, %v1304_v7 }

</bundles_post_ra>
